<compile_context>
chip_gen: v7x
topology: tpu7x:2x2x1
jax: 0.10.0
libtpu: 0.0.40
codegen_flags: <defaults>
</compile_context>

<pallas_src>
import jax
import jax.numpy as jnp
from jax.experimental import pallas as pl
from jax.experimental.pallas import tpu as pltpu

# ---------------- synthetic model config ----------------
VOCAB = 256
HIDDEN = 64
N_LAYERS = 2
N_HEADS = 4
HEAD_DIM = HIDDEN // N_HEADS
INTERMEDIATE = 128
ROPE_THETA = 10000.0
RMS_EPS = 1e-6
IMAGE_TOKEN_ID = 5          # synthetic stand-in for model.config.image_token_id
IGNORE_INDEX = -100         # nn.CrossEntropyLoss default


# ---------------- fused forward kernel (one grid step per batch row) ----------------
def _fused_forward_kernel(x_ref, amask_ref, labels_ref, cos_ref, sin_ref,
                          ln1_ref, ln2_ref, wqkv_ref, bqkv_ref, wo_ref,
                          wgu_ref, wd_ref, fnorm_ref, lmh_ref,
                          logits_ref, lsum_ref, lcnt_ref):
    S, H = x_ref.shape                       # (seq, hidden) for this batch row
    Dh = HEAD_DIM
    scale = 1.0 / (Dh ** 0.5)

    x = x_ref[...].astype(jnp.float32)       # (S, H)
    cos = cos_ref[...]                       # (S, Dh)
    sin = sin_ref[...]                       # (S, Dh)

    # ---- additive causal + key-padding bias, built in-kernel (VPU only) ----
    row = jax.lax.broadcasted_iota(jnp.int32, (S, S), 0)
    col = jax.lax.broadcasted_iota(jnp.int32, (S, S), 1)
    key_ok = amask_ref[...] > 0.0                        # (1, S) -> broadcast over rows
    allowed = jnp.logical_and(col <= row, key_ok)        # (S, S)
    bias = jnp.where(allowed, 0.0, -1e9).astype(jnp.float32)

    def _rms(v, w_row):                      # v: (S, H), w_row: (1, H)
        var = jnp.mean(v * v, axis=-1, keepdims=True)
        return v * jax.lax.rsqrt(var + RMS_EPS) * w_row

    def _rot_half(t):                        # RoPE rotate_half on last dim
        half = t.shape[-1] // 2
        return jnp.concatenate([-t[:, half:], t[:, :half]], axis=-1)

    for l in range(N_LAYERS):
        # ---------------- attention block ----------------
        h = _rms(x, ln1_ref[l])                                           # (S, H)
        qkv = jnp.dot(h, wqkv_ref[l],
                      preferred_element_type=jnp.float32) + bqkv_ref[l]   # (S, 3H)

        head_outs = []
        for hd in range(N_HEADS):
            q = qkv[:, hd * Dh:(hd + 1) * Dh]                             # (S, Dh)
            k = qkv[:, H + hd * Dh:H + (hd + 1) * Dh]
            v = qkv[:, 2 * H + hd * Dh:2 * H + (hd + 1) * Dh]
            q = q * cos + _rot_half(q) * sin
            k = k * cos + _rot_half(k) * sin
            s = jax.lax.dot_general(q, k, (((1,), (1,)), ((), ())),
                                    preferred_element_type=jnp.float32)   # (S, S)
            s = s * scale + bias
            m = jnp.max(s, axis=-1, keepdims=True)
            p = jnp.exp(s - m)
            p = p * pl.reciprocal(jnp.sum(p, axis=-1, keepdims=True), approx=True)
            head_outs.append(jnp.dot(p, v, preferred_element_type=jnp.float32))
        attn = jnp.concatenate(head_outs, axis=-1)                        # (S, H)
        x = x + jnp.dot(attn, wo_ref[l], preferred_element_type=jnp.float32)

        # ---------------- SwiGLU MLP block ----------------
        h2 = _rms(x, ln2_ref[l])
        gu = jnp.dot(h2, wgu_ref[l], preferred_element_type=jnp.float32)  # (S, 2I)
        g = gu[:, :INTERMEDIATE]
        u = gu[:, INTERMEDIATE:]
        act = g * jax.nn.sigmoid(g) * u
        x = x + jnp.dot(act, wd_ref[l], preferred_element_type=jnp.float32)

    # ---------------- final norm + lm_head + shifted cross-entropy ----------------
    xf = _rms(x, fnorm_ref[...])
    logits = jnp.dot(xf, lmh_ref[...], preferred_element_type=jnp.float32)  # (S, V)
    logits_ref[...] = logits

    lab = labels_ref[...]                    # (S, 1) int32, already shifted
    m = jnp.max(logits, axis=-1, keepdims=True)
    lse = jnp.log(jnp.sum(jnp.exp(logits - m), axis=-1, keepdims=True)) + m
    colv = jax.lax.broadcasted_iota(jnp.int32, logits.shape, 1)
    onehot = (colv == lab).astype(jnp.float32)
    picked = jnp.sum(logits * onehot, axis=-1, keepdims=True)              # (S, 1)
    valid = (lab != IGNORE_INDEX).astype(jnp.float32)                      # (S, 1)
    loss_terms = (lse - picked) * valid                                    # (S, 1)
    # Full-ref (1,1) stores via keepdims reductions (robust scalar writeback).
    lsum_ref[...] = jnp.sum(loss_terms, axis=0, keepdims=True)
    lcnt_ref[...] = jnp.sum(valid, axis=0, keepdims=True)


def fused_forward(x, amask, labels_shifted, cos, sin, params):
    """x: (B, S, H) merged embeddings. Returns (logits (B,S,V), lsum (B,1,1), lcnt (B,1,1))."""
    B, S, H = x.shape
    L = N_LAYERS
    I = INTERMEDIATE
    V = VOCAB
    Dh = HEAD_DIM

    return pl.pallas_call(
        _fused_forward_kernel,
        out_shape=(jax.ShapeDtypeStruct((B, S, V), jnp.float32),
                   jax.ShapeDtypeStruct((B, 1, 1), jnp.float32),
                   jax.ShapeDtypeStruct((B, 1, 1), jnp.float32)),
        grid=(B,),
        in_specs=[
            pl.BlockSpec((None, S, H), lambda b: (b, 0, 0)),      # x (per batch row)
            pl.BlockSpec((None, 1, S), lambda b: (b, 0, 0)),      # attention mask row
            pl.BlockSpec((None, S, 1), lambda b: (b, 0, 0)),      # shifted labels
            pl.BlockSpec((S, Dh), lambda b: (0, 0)),              # RoPE cos
            pl.BlockSpec((S, Dh), lambda b: (0, 0)),              # RoPE sin
            pl.BlockSpec((L, 1, H), lambda b: (0, 0, 0)),         # ln1
            pl.BlockSpec((L, 1, H), lambda b: (0, 0, 0)),         # ln2
            pl.BlockSpec((L, H, 3 * H), lambda b: (0, 0, 0)),     # wqkv (fused q|k|v)
            pl.BlockSpec((L, 1, 3 * H), lambda b: (0, 0, 0)),     # bqkv (fused bias)
            pl.BlockSpec((L, H, H), lambda b: (0, 0, 0)),         # wo
            pl.BlockSpec((L, H, 2 * I), lambda b: (0, 0, 0)),     # w_gate|up (fused)
            pl.BlockSpec((L, I, H), lambda b: (0, 0, 0)),         # w_down
            pl.BlockSpec((1, H), lambda b: (0, 0)),               # final norm
            pl.BlockSpec((H, V), lambda b: (0, 0)),               # lm_head
        ],
        out_specs=(
            pl.BlockSpec((None, S, V), lambda b: (b, 0, 0)),      # logits
            pl.BlockSpec((None, 1, 1), lambda b: (b, 0, 0)),      # per-row loss sum
            pl.BlockSpec((None, 1, 1), lambda b: (b, 0, 0)),      # per-row valid count
        ),
        compiler_params=pltpu.CompilerParams(
            dimension_semantics=("parallel",)),                   # batch-parallel
    )(x, amask, labels_shifted, cos, sin,
      params["ln1"], params["ln2"], params["wqkv"], params["bqkv"],
      params["wo"], params["wgu"], params["wd"],
      params["final_norm"], params["lm_head"])


# ---------------- parameter init (deterministic, synthetic, pre-fused layout) ----------------
def init_params(key):
    std = 0.02
    L, H, I, V = N_LAYERS, HIDDEN, INTERMEDIATE, VOCAB
    ks = jax.random.split(key, 8)
    params = {
        "embed": jax.random.normal(ks[0], (V, H), jnp.float32) * std,
        "lm_head": jax.random.normal(ks[1], (H, V), jnp.float32) * std,
        "final_norm": jnp.ones((1, H), jnp.float32),
        "ln1": jnp.ones((L, 1, H), jnp.float32),
        "ln2": jnp.ones((L, 1, H), jnp.float32),
        # fused q|k|v projection and bias (Qwen2 attention has qkv bias)
        "wqkv": jax.random.normal(ks[2], (L, H, 3 * H), jnp.float32) * std,
        "bqkv": jax.random.normal(ks[3], (L, 1, 3 * H), jnp.float32) * std,
        "wo": jax.random.normal(ks[4], (L, H, H), jnp.float32) * std,
        # fused gate|up projection for SwiGLU MLP
        "wgu": jax.random.normal(ks[5], (L, H, 2 * I), jnp.float32) * std,
        "wd": jax.random.normal(ks[6], (L, I, H), jnp.float32) * std,
    }
    return params


# ---------------- RoPE tables (glue) ----------------
def rope_cos_sin(seq_len, dim, theta=ROPE_THETA):
    inv_freq = 1.0 / (theta ** (jnp.arange(0, dim, 2, dtype=jnp.float32) / dim))
    pos = jnp.arange(seq_len, dtype=jnp.float32)
    freqs = jnp.outer(pos, inv_freq)                   # (S, dim/2)
    emb = jnp.concatenate([freqs, freqs], axis=-1)     # (S, dim)
    return jnp.cos(emb), jnp.sin(emb)


# ---------------- full forward (mirrors the PyTorch module) ----------------
def forward(params, input_ids, attention_mask, labels, image_embeddings):
    B, S = input_ids.shape

    # 1) embed_tokens(input_ids)  (gather kept as JAX glue)
    tok_emb = jnp.take(params["embed"], input_ids, axis=0)          # (B, S, H)

    # 2) masked_scatter of image embeddings: the k-th image-token position in
    #    row i receives image_embeddings[i, k] (per-row masked_scatter with a
    #    full-hidden mask consumes one image row per image token).
    mask = input_ids == IMAGE_TOKEN_ID                              # (B, S)
    idx = jnp.clip(jnp.cumsum(mask, axis=1) - 1, 0,
                   image_embeddings.shape[1] - 1)
    gathered = jnp.take_along_axis(image_embeddings, idx[..., None], axis=1)
    x = jnp.where(mask[..., None], gathered, tok_emb)               # (B, S, H)

    # RoPE tables and padding mask (causal bias is built inside the kernel)
    cos, sin = rope_cos_sin(S, HEAD_DIM)                            # (S, Dh)
    amask = attention_mask.astype(jnp.float32).reshape(B, 1, S)

    # shifted labels: position s gets labels[:, s+1]; last position ignored.
    if labels is not None:
        lab_shift = jnp.concatenate(
            [labels[:, 1:],
             jnp.full((B, 1), IGNORE_INDEX, labels.dtype)], axis=1)
    else:
        lab_shift = jnp.full((B, S), IGNORE_INDEX, jnp.int32)
    lab_shift = lab_shift.astype(jnp.int32).reshape(B, S, 1)

    # 3) single fused Pallas kernel: decoder layers + final norm + lm_head + CE
    logits, lsum, lcnt = fused_forward(x, amask, lab_shift, cos, sin, params)

    loss = None
    if labels is not None:
        loss = jnp.sum(lsum) / jnp.maximum(jnp.sum(lcnt), 1.0)

    return {"loss": loss, "logits": logits}


if __name__ == "__main__":
    key = jax.random.PRNGKey(0)
    kp, ki, kimg, klab = jax.random.split(key, 4)

    params = init_params(kp)

    B, S = 2, 8
    NUM_IMG = 3
    input_ids = jax.random.randint(ki, (B, S), 0, VOCAB, dtype=jnp.int32)
    # avoid accidental image tokens, then place NUM_IMG image tokens per row
    input_ids = jnp.where(input_ids == IMAGE_TOKEN_ID, IMAGE_TOKEN_ID + 1, input_ids)
    input_ids = input_ids.at[:, 1:1 + NUM_IMG].set(IMAGE_TOKEN_ID)

    attention_mask = jnp.ones((B, S), jnp.int32)
    labels = jax.random.randint(klab, (B, S), 0, VOCAB, dtype=jnp.int32)
    labels = jnp.where(input_ids == IMAGE_TOKEN_ID, IGNORE_INDEX, labels)
    image_embeddings = jax.random.normal(kimg, (B, NUM_IMG, HIDDEN), jnp.float32) * 0.02

    fwd = jax.jit(forward)
    out = fwd(params, input_ids, attention_mask, labels, image_embeddings)
    jax.block_until_ready(out["logits"])
    jax.block_until_ready(out["loss"])

    assert out["logits"].shape == (B, S, VOCAB)
    assert bool(jnp.isfinite(out["loss"]))
    print("KERNEL_OK")
</pallas_src>

<mosaic_0001>
module attributes {stable_mosaic.version = 11 : i64} {
  func.func @_fused_forward_kernel(%arg0: i32, %arg1: memref<1x8x64xf32, #tpu.memory_space<vmem>>, %arg2: memref<1x1x8xf32, #tpu.memory_space<vmem>>, %arg3: memref<1x8x1xi32, #tpu.memory_space<vmem>>, %arg4: memref<8x16xf32, #tpu.memory_space<vmem>>, %arg5: memref<8x16xf32, #tpu.memory_space<vmem>>, %arg6: memref<2x1x64xf32, #tpu.memory_space<vmem>>, %arg7: memref<2x1x64xf32, #tpu.memory_space<vmem>>, %arg8: memref<2x64x192xf32, #tpu.memory_space<vmem>>, %arg9: memref<2x1x192xf32, #tpu.memory_space<vmem>>, %arg10: memref<2x64x64xf32, #tpu.memory_space<vmem>>, %arg11: memref<2x64x256xf32, #tpu.memory_space<vmem>>, %arg12: memref<2x128x64xf32, #tpu.memory_space<vmem>>, %arg13: memref<1x64xf32, #tpu.memory_space<vmem>>, %arg14: memref<64x256xf32, #tpu.memory_space<vmem>>, %arg15: memref<1x8x256xf32, #tpu.memory_space<vmem>>, %arg16: memref<1x1x1xf32, #tpu.memory_space<vmem>>, %arg17: memref<1x1x1xf32, #tpu.memory_space<vmem>>) attributes {dimension_semantics = [#tpu.dimension_semantics<parallel>], iteration_bounds = array<i64: 2>, scalar_prefetch = 0 : i64, scratch_operands = 0 : i64, tpu.core_type = #tpu.core_type<tc>, window_params = [{transform_indices = @transform_0, window_bounds = array<i64: 1, 8, 64>}, {transform_indices = @transform_1, window_bounds = array<i64: 1, 1, 8>}, {transform_indices = @transform_2, window_bounds = array<i64: 1, 8, 1>}, {pipeline_mode = #tpu.pipeline_mode<synchronous>, transform_indices = @transform_3, window_bounds = array<i64: 8, 16>}, {pipeline_mode = #tpu.pipeline_mode<synchronous>, transform_indices = @transform_4, window_bounds = array<i64: 8, 16>}, {pipeline_mode = #tpu.pipeline_mode<synchronous>, transform_indices = @transform_5, window_bounds = array<i64: 2, 1, 64>}, {pipeline_mode = #tpu.pipeline_mode<synchronous>, transform_indices = @transform_6, window_bounds = array<i64: 2, 1, 64>}, {pipeline_mode = #tpu.pipeline_mode<synchronous>, transform_indices = @transform_7, window_bounds = array<i64: 2, 64, 192>}, {pipeline_mode = #tpu.pipeline_mode<synchronous>, transform_indices = @transform_8, window_bounds = array<i64: 2, 1, 192>}, {pipeline_mode = #tpu.pipeline_mode<synchronous>, transform_indices = @transform_9, window_bounds = array<i64: 2, 64, 64>}, {pipeline_mode = #tpu.pipeline_mode<synchronous>, transform_indices = @transform_10, window_bounds = array<i64: 2, 64, 256>}, {pipeline_mode = #tpu.pipeline_mode<synchronous>, transform_indices = @transform_11, window_bounds = array<i64: 2, 128, 64>}, {pipeline_mode = #tpu.pipeline_mode<synchronous>, transform_indices = @transform_12, window_bounds = array<i64: 1, 64>}, {pipeline_mode = #tpu.pipeline_mode<synchronous>, transform_indices = @transform_13, window_bounds = array<i64: 64, 256>}, {transform_indices = @transform_14, window_bounds = array<i64: 1, 8, 256>}, {transform_indices = @transform_15, window_bounds = array<i64: 1, 1, 1>}, {transform_indices = @transform_16, window_bounds = array<i64: 1, 1, 1>}]} {
    %c0 = arith.constant 0 : index
    %c0_0 = arith.constant 0 : index
    %c0_1 = arith.constant 0 : index
    %0 = vector.load %arg1[%c0, %c0_0, %c0_1] : memref<1x8x64xf32, #tpu.memory_space<vmem>>, vector<1x8x64xf32>
    %1 = vector.shape_cast %0 : vector<1x8x64xf32> to vector<8x64xf32>
    %c0_2 = arith.constant 0 : index
    %c0_3 = arith.constant 0 : index
    %2 = vector.load %arg4[%c0_2, %c0_3] : memref<8x16xf32, #tpu.memory_space<vmem>>, vector<8x16xf32>
    %c0_4 = arith.constant 0 : index
    %c0_5 = arith.constant 0 : index
    %3 = vector.load %arg5[%c0_4, %c0_5] : memref<8x16xf32, #tpu.memory_space<vmem>>, vector<8x16xf32>
    %4 = tpu.iota {dimensions = array<i32: 0>} : vector<8x8xi32>
    %5 = tpu.iota {dimensions = array<i32: 1>} : vector<8x8xi32>
    %c0_6 = arith.constant 0 : index
    %c0_7 = arith.constant 0 : index
    %c0_8 = arith.constant 0 : index
    %6 = vector.load %arg2[%c0_6, %c0_7, %c0_8] : memref<1x1x8xf32, #tpu.memory_space<vmem>>, vector<1x1x8xf32>
    %7 = vector.shape_cast %6 : vector<1x1x8xf32> to vector<1x8xf32>
    %cst = arith.constant 0.000000e+00 : f32
    %8 = vector.broadcast %cst : f32 to vector<1x8xf32>
    %9 = arith.cmpf ogt, %7, %8 : vector<1x8xf32>
    %10 = arith.cmpi sle, %5, %4 : vector<8x8xi32>
    %11 = vector.broadcast %9 : vector<1x8xi1> to vector<8x8xi1>
    %12 = arith.andi %10, %11 : vector<8x8xi1>
    %cst_9 = arith.constant 0.000000e+00 : f32
    %cst_10 = arith.constant -1.000000e+09 : f32
    %13 = vector.broadcast %cst_9 : f32 to vector<8x8xf32>
    %14 = vector.broadcast %cst_10 : f32 to vector<8x8xf32>
    %15 = arith.select %12, %13, %14 : vector<8x8xi1>, vector<8x8xf32>
    %c0_11 = arith.constant 0 : index
    %c0_12 = arith.constant 0 : index
    %c0_13 = arith.constant 0 : index
    %16 = vector.load %arg6[%c0_11, %c0_12, %c0_13] : memref<2x1x64xf32, #tpu.memory_space<vmem>>, vector<1x1x64xf32>
    %17 = vector.shape_cast %16 : vector<1x1x64xf32> to vector<1x64xf32>
    %18 = arith.mulf %1, %1 : vector<8x64xf32>
    %cst_14 = arith.constant dense<0.000000e+00> : vector<8xf32>
    %19 = vector.multi_reduction <add>, %18, %cst_14 [1] : vector<8x64xf32> to vector<8xf32>
    %20 = vector.shape_cast %19 : vector<8xf32> to vector<8x1xf32>
    %cst_15 = arith.constant 6.400000e+01 : f32
    %21 = vector.broadcast %cst_15 : f32 to vector<8x1xf32>
    %22 = arith.divf %20, %21 : vector<8x1xf32>
    %cst_16 = arith.constant 9.99999997E-7 : f32
    %23 = vector.broadcast %cst_16 : f32 to vector<8x1xf32>
    %24 = arith.addf %22, %23 : vector<8x1xf32>
    %25 = math.rsqrt %24 : vector<8x1xf32>
    %26 = vector.broadcast %25 : vector<8x1xf32> to vector<8x64xf32>
    %27 = arith.mulf %1, %26 : vector<8x64xf32>
    %28 = vector.broadcast %17 : vector<1x64xf32> to vector<8x64xf32>
    %29 = arith.mulf %27, %28 : vector<8x64xf32>
    %c0_17 = arith.constant 0 : index
    %c0_18 = arith.constant 0 : index
    %c0_19 = arith.constant 0 : index
    %30 = vector.load %arg8[%c0_17, %c0_18, %c0_19] : memref<2x64x192xf32, #tpu.memory_space<vmem>>, vector<1x64x192xf32>
    %31 = vector.shape_cast %30 : vector<1x64x192xf32> to vector<64x192xf32>
    %cst_20 = arith.constant dense<0.000000e+00> : vector<8x192xf32>
    %32 = tpu.matmul %29, %31, %cst_20 {dimension_numbers = #tpu.dot_dimension_numbers<[1], [0], [0], [1], [0, 0, 1, 1], [], []>} : vector<8x64xf32>, vector<64x192xf32>, vector<8x192xf32> -> vector<8x192xf32>
    %c0_21 = arith.constant 0 : index
    %c0_22 = arith.constant 0 : index
    %c0_23 = arith.constant 0 : index
    %33 = vector.load %arg9[%c0_21, %c0_22, %c0_23] : memref<2x1x192xf32, #tpu.memory_space<vmem>>, vector<1x1x192xf32>
    %34 = vector.shape_cast %33 : vector<1x1x192xf32> to vector<1x192xf32>
    %35 = vector.broadcast %34 : vector<1x192xf32> to vector<8x192xf32>
    %36 = arith.addf %32, %35 : vector<8x192xf32>
    %37 = vector.extract_strided_slice %36 {offsets = [0, 0], sizes = [8, 16], strides = [1, 1]} : vector<8x192xf32> to vector<8x16xf32>
    %38 = vector.extract_strided_slice %36 {offsets = [0, 64], sizes = [8, 16], strides = [1, 1]} : vector<8x192xf32> to vector<8x16xf32>
    %39 = vector.extract_strided_slice %36 {offsets = [0, 128], sizes = [8, 16], strides = [1, 1]} : vector<8x192xf32> to vector<8x16xf32>
    %40 = arith.mulf %37, %2 : vector<8x16xf32>
    %41 = vector.extract_strided_slice %37 {offsets = [0, 8], sizes = [8, 8], strides = [1, 1]} : vector<8x16xf32> to vector<8x8xf32>
    %cst_24 = arith.constant 0.000000e+00 : f32
    %42 = vector.broadcast %cst_24 : f32 to vector<8x8xf32>
    %43 = arith.subf %42, %41 : vector<8x8xf32>
    %44 = vector.extract_strided_slice %37 {offsets = [0, 0], sizes = [8, 8], strides = [1, 1]} : vector<8x16xf32> to vector<8x8xf32>
    %45 = tpu.concatenate %43, %44 in 1 : vector<8x8xf32>, vector<8x8xf32> -> vector<8x16xf32>
    %46 = arith.mulf %45, %3 : vector<8x16xf32>
    %47 = arith.addf %40, %46 : vector<8x16xf32>
    %48 = arith.mulf %38, %2 : vector<8x16xf32>
    %49 = vector.extract_strided_slice %38 {offsets = [0, 8], sizes = [8, 8], strides = [1, 1]} : vector<8x16xf32> to vector<8x8xf32>
    %cst_25 = arith.constant 0.000000e+00 : f32
    %50 = vector.broadcast %cst_25 : f32 to vector<8x8xf32>
    %51 = arith.subf %50, %49 : vector<8x8xf32>
    %52 = vector.extract_strided_slice %38 {offsets = [0, 0], sizes = [8, 8], strides = [1, 1]} : vector<8x16xf32> to vector<8x8xf32>
    %53 = tpu.concatenate %51, %52 in 1 : vector<8x8xf32>, vector<8x8xf32> -> vector<8x16xf32>
    %54 = arith.mulf %53, %3 : vector<8x16xf32>
    %55 = arith.addf %48, %54 : vector<8x16xf32>
    %cst_26 = arith.constant dense<0.000000e+00> : vector<8x8xf32>
    %56 = tpu.matmul %47, %55, %cst_26 {dimension_numbers = #tpu.dot_dimension_numbers<[1], [1], [0], [0], [0, 0, 1, 0], [], []>} : vector<8x16xf32>, vector<8x16xf32>, vector<8x8xf32> -> vector<8x8xf32>
    %cst_27 = arith.constant 2.500000e-01 : f32
    %57 = vector.broadcast %cst_27 : f32 to vector<8x8xf32>
    %58 = arith.mulf %56, %57 : vector<8x8xf32>
    %59 = arith.addf %58, %15 : vector<8x8xf32>
    %cst_28 = arith.constant dense<0xFF800000> : vector<8xf32>
    %60 = vector.multi_reduction <maximumf>, %59, %cst_28 [1] : vector<8x8xf32> to vector<8xf32>
    %61 = vector.shape_cast %60 : vector<8xf32> to vector<8x1xf32>
    %62 = vector.broadcast %61 : vector<8x1xf32> to vector<8x8xf32>
    %63 = arith.subf %59, %62 : vector<8x8xf32>
    %64 = math.exp %63 : vector<8x8xf32>
    %cst_29 = arith.constant dense<0.000000e+00> : vector<8xf32>
    %65 = vector.multi_reduction <add>, %64, %cst_29 [1] : vector<8x8xf32> to vector<8xf32>
    %66 = vector.shape_cast %65 : vector<8xf32> to vector<8x1xf32>
    %67 = tpu.reciprocal %66 {approx = true} : vector<8x1xf32> -> vector<8x1xf32>
    %68 = vector.broadcast %67 : vector<8x1xf32> to vector<8x8xf32>
    %69 = arith.mulf %64, %68 : vector<8x8xf32>
    %cst_30 = arith.constant dense<0.000000e+00> : vector<8x16xf32>
    %70 = tpu.matmul %69, %39, %cst_30 {dimension_numbers = #tpu.dot_dimension_numbers<[1], [0], [0], [1], [0, 0, 1, 1], [], []>} : vector<8x8xf32>, vector<8x16xf32>, vector<8x16xf32> -> vector<8x16xf32>
    %71 = vector.extract_strided_slice %36 {offsets = [0, 16], sizes = [8, 16], strides = [1, 1]} : vector<8x192xf32> to vector<8x16xf32>
    %72 = vector.extract_strided_slice %36 {offsets = [0, 80], sizes = [8, 16], strides = [1, 1]} : vector<8x192xf32> to vector<8x16xf32>
    %73 = vector.extract_strided_slice %36 {offsets = [0, 144], sizes = [8, 16], strides = [1, 1]} : vector<8x192xf32> to vector<8x16xf32>
    %74 = arith.mulf %71, %2 : vector<8x16xf32>
    %75 = vector.extract_strided_slice %71 {offsets = [0, 8], sizes = [8, 8], strides = [1, 1]} : vector<8x16xf32> to vector<8x8xf32>
    %cst_31 = arith.constant 0.000000e+00 : f32
    %76 = vector.broadcast %cst_31 : f32 to vector<8x8xf32>
    %77 = arith.subf %76, %75 : vector<8x8xf32>
    %78 = vector.extract_strided_slice %71 {offsets = [0, 0], sizes = [8, 8], strides = [1, 1]} : vector<8x16xf32> to vector<8x8xf32>
    %79 = tpu.concatenate %77, %78 in 1 : vector<8x8xf32>, vector<8x8xf32> -> vector<8x16xf32>
    %80 = arith.mulf %79, %3 : vector<8x16xf32>
    %81 = arith.addf %74, %80 : vector<8x16xf32>
    %82 = arith.mulf %72, %2 : vector<8x16xf32>
    %83 = vector.extract_strided_slice %72 {offsets = [0, 8], sizes = [8, 8], strides = [1, 1]} : vector<8x16xf32> to vector<8x8xf32>
    %cst_32 = arith.constant 0.000000e+00 : f32
    %84 = vector.broadcast %cst_32 : f32 to vector<8x8xf32>
    %85 = arith.subf %84, %83 : vector<8x8xf32>
    %86 = vector.extract_strided_slice %72 {offsets = [0, 0], sizes = [8, 8], strides = [1, 1]} : vector<8x16xf32> to vector<8x8xf32>
    %87 = tpu.concatenate %85, %86 in 1 : vector<8x8xf32>, vector<8x8xf32> -> vector<8x16xf32>
    %88 = arith.mulf %87, %3 : vector<8x16xf32>
    %89 = arith.addf %82, %88 : vector<8x16xf32>
    %cst_33 = arith.constant dense<0.000000e+00> : vector<8x8xf32>
    %90 = tpu.matmul %81, %89, %cst_33 {dimension_numbers = #tpu.dot_dimension_numbers<[1], [1], [0], [0], [0, 0, 1, 0], [], []>} : vector<8x16xf32>, vector<8x16xf32>, vector<8x8xf32> -> vector<8x8xf32>
    %cst_34 = arith.constant 2.500000e-01 : f32
    %91 = vector.broadcast %cst_34 : f32 to vector<8x8xf32>
    %92 = arith.mulf %90, %91 : vector<8x8xf32>
    %93 = arith.addf %92, %15 : vector<8x8xf32>
    %cst_35 = arith.constant dense<0xFF800000> : vector<8xf32>
    %94 = vector.multi_reduction <maximumf>, %93, %cst_35 [1] : vector<8x8xf32> to vector<8xf32>
    %95 = vector.shape_cast %94 : vector<8xf32> to vector<8x1xf32>
    %96 = vector.broadcast %95 : vector<8x1xf32> to vector<8x8xf32>
    %97 = arith.subf %93, %96 : vector<8x8xf32>
    %98 = math.exp %97 : vector<8x8xf32>
    %cst_36 = arith.constant dense<0.000000e+00> : vector<8xf32>
    %99 = vector.multi_reduction <add>, %98, %cst_36 [1] : vector<8x8xf32> to vector<8xf32>
    %100 = vector.shape_cast %99 : vector<8xf32> to vector<8x1xf32>
    %101 = tpu.reciprocal %100 {approx = true} : vector<8x1xf32> -> vector<8x1xf32>
    %102 = vector.broadcast %101 : vector<8x1xf32> to vector<8x8xf32>
    %103 = arith.mulf %98, %102 : vector<8x8xf32>
    %cst_37 = arith.constant dense<0.000000e+00> : vector<8x16xf32>
    %104 = tpu.matmul %103, %73, %cst_37 {dimension_numbers = #tpu.dot_dimension_numbers<[1], [0], [0], [1], [0, 0, 1, 1], [], []>} : vector<8x8xf32>, vector<8x16xf32>, vector<8x16xf32> -> vector<8x16xf32>
    %105 = vector.extract_strided_slice %36 {offsets = [0, 32], sizes = [8, 16], strides = [1, 1]} : vector<8x192xf32> to vector<8x16xf32>
    %106 = vector.extract_strided_slice %36 {offsets = [0, 96], sizes = [8, 16], strides = [1, 1]} : vector<8x192xf32> to vector<8x16xf32>
    %107 = vector.extract_strided_slice %36 {offsets = [0, 160], sizes = [8, 16], strides = [1, 1]} : vector<8x192xf32> to vector<8x16xf32>
    %108 = arith.mulf %105, %2 : vector<8x16xf32>
    %109 = vector.extract_strided_slice %105 {offsets = [0, 8], sizes = [8, 8], strides = [1, 1]} : vector<8x16xf32> to vector<8x8xf32>
    %cst_38 = arith.constant 0.000000e+00 : f32
    %110 = vector.broadcast %cst_38 : f32 to vector<8x8xf32>
    %111 = arith.subf %110, %109 : vector<8x8xf32>
    %112 = vector.extract_strided_slice %105 {offsets = [0, 0], sizes = [8, 8], strides = [1, 1]} : vector<8x16xf32> to vector<8x8xf32>
    %113 = tpu.concatenate %111, %112 in 1 : vector<8x8xf32>, vector<8x8xf32> -> vector<8x16xf32>
    %114 = arith.mulf %113, %3 : vector<8x16xf32>
    %115 = arith.addf %108, %114 : vector<8x16xf32>
    %116 = arith.mulf %106, %2 : vector<8x16xf32>
    %117 = vector.extract_strided_slice %106 {offsets = [0, 8], sizes = [8, 8], strides = [1, 1]} : vector<8x16xf32> to vector<8x8xf32>
    %cst_39 = arith.constant 0.000000e+00 : f32
    %118 = vector.broadcast %cst_39 : f32 to vector<8x8xf32>
    %119 = arith.subf %118, %117 : vector<8x8xf32>
    %120 = vector.extract_strided_slice %106 {offsets = [0, 0], sizes = [8, 8], strides = [1, 1]} : vector<8x16xf32> to vector<8x8xf32>
    %121 = tpu.concatenate %119, %120 in 1 : vector<8x8xf32>, vector<8x8xf32> -> vector<8x16xf32>
    %122 = arith.mulf %121, %3 : vector<8x16xf32>
    %123 = arith.addf %116, %122 : vector<8x16xf32>
    %cst_40 = arith.constant dense<0.000000e+00> : vector<8x8xf32>
    %124 = tpu.matmul %115, %123, %cst_40 {dimension_numbers = #tpu.dot_dimension_numbers<[1], [1], [0], [0], [0, 0, 1, 0], [], []>} : vector<8x16xf32>, vector<8x16xf32>, vector<8x8xf32> -> vector<8x8xf32>
    %cst_41 = arith.constant 2.500000e-01 : f32
    %125 = vector.broadcast %cst_41 : f32 to vector<8x8xf32>
    %126 = arith.mulf %124, %125 : vector<8x8xf32>
    %127 = arith.addf %126, %15 : vector<8x8xf32>
    %cst_42 = arith.constant dense<0xFF800000> : vector<8xf32>
    %128 = vector.multi_reduction <maximumf>, %127, %cst_42 [1] : vector<8x8xf32> to vector<8xf32>
    %129 = vector.shape_cast %128 : vector<8xf32> to vector<8x1xf32>
    %130 = vector.broadcast %129 : vector<8x1xf32> to vector<8x8xf32>
    %131 = arith.subf %127, %130 : vector<8x8xf32>
    %132 = math.exp %131 : vector<8x8xf32>
    %cst_43 = arith.constant dense<0.000000e+00> : vector<8xf32>
    %133 = vector.multi_reduction <add>, %132, %cst_43 [1] : vector<8x8xf32> to vector<8xf32>
    %134 = vector.shape_cast %133 : vector<8xf32> to vector<8x1xf32>
    %135 = tpu.reciprocal %134 {approx = true} : vector<8x1xf32> -> vector<8x1xf32>
    %136 = vector.broadcast %135 : vector<8x1xf32> to vector<8x8xf32>
    %137 = arith.mulf %132, %136 : vector<8x8xf32>
    %cst_44 = arith.constant dense<0.000000e+00> : vector<8x16xf32>
    %138 = tpu.matmul %137, %107, %cst_44 {dimension_numbers = #tpu.dot_dimension_numbers<[1], [0], [0], [1], [0, 0, 1, 1], [], []>} : vector<8x8xf32>, vector<8x16xf32>, vector<8x16xf32> -> vector<8x16xf32>
    %139 = vector.extract_strided_slice %36 {offsets = [0, 48], sizes = [8, 16], strides = [1, 1]} : vector<8x192xf32> to vector<8x16xf32>
    %140 = vector.extract_strided_slice %36 {offsets = [0, 112], sizes = [8, 16], strides = [1, 1]} : vector<8x192xf32> to vector<8x16xf32>
    %141 = vector.extract_strided_slice %36 {offsets = [0, 176], sizes = [8, 16], strides = [1, 1]} : vector<8x192xf32> to vector<8x16xf32>
    %142 = arith.mulf %139, %2 : vector<8x16xf32>
    %143 = vector.extract_strided_slice %139 {offsets = [0, 8], sizes = [8, 8], strides = [1, 1]} : vector<8x16xf32> to vector<8x8xf32>
    %cst_45 = arith.constant 0.000000e+00 : f32
    %144 = vector.broadcast %cst_45 : f32 to vector<8x8xf32>
    %145 = arith.subf %144, %143 : vector<8x8xf32>
    %146 = vector.extract_strided_slice %139 {offsets = [0, 0], sizes = [8, 8], strides = [1, 1]} : vector<8x16xf32> to vector<8x8xf32>
    %147 = tpu.concatenate %145, %146 in 1 : vector<8x8xf32>, vector<8x8xf32> -> vector<8x16xf32>
    %148 = arith.mulf %147, %3 : vector<8x16xf32>
    %149 = arith.addf %142, %148 : vector<8x16xf32>
    %150 = arith.mulf %140, %2 : vector<8x16xf32>
    %151 = vector.extract_strided_slice %140 {offsets = [0, 8], sizes = [8, 8], strides = [1, 1]} : vector<8x16xf32> to vector<8x8xf32>
    %cst_46 = arith.constant 0.000000e+00 : f32
    %152 = vector.broadcast %cst_46 : f32 to vector<8x8xf32>
    %153 = arith.subf %152, %151 : vector<8x8xf32>
    %154 = vector.extract_strided_slice %140 {offsets = [0, 0], sizes = [8, 8], strides = [1, 1]} : vector<8x16xf32> to vector<8x8xf32>
    %155 = tpu.concatenate %153, %154 in 1 : vector<8x8xf32>, vector<8x8xf32> -> vector<8x16xf32>
    %156 = arith.mulf %155, %3 : vector<8x16xf32>
    %157 = arith.addf %150, %156 : vector<8x16xf32>
    %cst_47 = arith.constant dense<0.000000e+00> : vector<8x8xf32>
    %158 = tpu.matmul %149, %157, %cst_47 {dimension_numbers = #tpu.dot_dimension_numbers<[1], [1], [0], [0], [0, 0, 1, 0], [], []>} : vector<8x16xf32>, vector<8x16xf32>, vector<8x8xf32> -> vector<8x8xf32>
    %cst_48 = arith.constant 2.500000e-01 : f32
    %159 = vector.broadcast %cst_48 : f32 to vector<8x8xf32>
    %160 = arith.mulf %158, %159 : vector<8x8xf32>
    %161 = arith.addf %160, %15 : vector<8x8xf32>
    %cst_49 = arith.constant dense<0xFF800000> : vector<8xf32>
    %162 = vector.multi_reduction <maximumf>, %161, %cst_49 [1] : vector<8x8xf32> to vector<8xf32>
    %163 = vector.shape_cast %162 : vector<8xf32> to vector<8x1xf32>
    %164 = vector.broadcast %163 : vector<8x1xf32> to vector<8x8xf32>
    %165 = arith.subf %161, %164 : vector<8x8xf32>
    %166 = math.exp %165 : vector<8x8xf32>
    %cst_50 = arith.constant dense<0.000000e+00> : vector<8xf32>
    %167 = vector.multi_reduction <add>, %166, %cst_50 [1] : vector<8x8xf32> to vector<8xf32>
    %168 = vector.shape_cast %167 : vector<8xf32> to vector<8x1xf32>
    %169 = tpu.reciprocal %168 {approx = true} : vector<8x1xf32> -> vector<8x1xf32>
    %170 = vector.broadcast %169 : vector<8x1xf32> to vector<8x8xf32>
    %171 = arith.mulf %166, %170 : vector<8x8xf32>
    %cst_51 = arith.constant dense<0.000000e+00> : vector<8x16xf32>
    %172 = tpu.matmul %171, %141, %cst_51 {dimension_numbers = #tpu.dot_dimension_numbers<[1], [0], [0], [1], [0, 0, 1, 1], [], []>} : vector<8x8xf32>, vector<8x16xf32>, vector<8x16xf32> -> vector<8x16xf32>
    %173 = tpu.concatenate %70, %104, %138, %172 in 1 : vector<8x16xf32>, vector<8x16xf32>, vector<8x16xf32>, vector<8x16xf32> -> vector<8x64xf32>
    %c0_52 = arith.constant 0 : index
    %c0_53 = arith.constant 0 : index
    %c0_54 = arith.constant 0 : index
    %174 = vector.load %arg10[%c0_52, %c0_53, %c0_54] : memref<2x64x64xf32, #tpu.memory_space<vmem>>, vector<1x64x64xf32>
    %175 = vector.shape_cast %174 : vector<1x64x64xf32> to vector<64x64xf32>
    %cst_55 = arith.constant dense<0.000000e+00> : vector<8x64xf32>
    %176 = tpu.matmul %173, %175, %cst_55 {dimension_numbers = #tpu.dot_dimension_numbers<[1], [0], [0], [1], [0, 0, 1, 1], [], []>} : vector<8x64xf32>, vector<64x64xf32>, vector<8x64xf32> -> vector<8x64xf32>
    %177 = arith.addf %1, %176 : vector<8x64xf32>
    %c0_56 = arith.constant 0 : index
    %c0_57 = arith.constant 0 : index
    %c0_58 = arith.constant 0 : index
    %178 = vector.load %arg7[%c0_56, %c0_57, %c0_58] : memref<2x1x64xf32, #tpu.memory_space<vmem>>, vector<1x1x64xf32>
    %179 = vector.shape_cast %178 : vector<1x1x64xf32> to vector<1x64xf32>
    %180 = arith.mulf %177, %177 : vector<8x64xf32>
    %cst_59 = arith.constant dense<0.000000e+00> : vector<8xf32>
    %181 = vector.multi_reduction <add>, %180, %cst_59 [1] : vector<8x64xf32> to vector<8xf32>
    %182 = vector.shape_cast %181 : vector<8xf32> to vector<8x1xf32>
    %cst_60 = arith.constant 6.400000e+01 : f32
    %183 = vector.broadcast %cst_60 : f32 to vector<8x1xf32>
    %184 = arith.divf %182, %183 : vector<8x1xf32>
    %cst_61 = arith.constant 9.99999997E-7 : f32
    %185 = vector.broadcast %cst_61 : f32 to vector<8x1xf32>
    %186 = arith.addf %184, %185 : vector<8x1xf32>
    %187 = math.rsqrt %186 : vector<8x1xf32>
    %188 = vector.broadcast %187 : vector<8x1xf32> to vector<8x64xf32>
    %189 = arith.mulf %177, %188 : vector<8x64xf32>
    %190 = vector.broadcast %179 : vector<1x64xf32> to vector<8x64xf32>
    %191 = arith.mulf %189, %190 : vector<8x64xf32>
    %c0_62 = arith.constant 0 : index
    %c0_63 = arith.constant 0 : index
    %c0_64 = arith.constant 0 : index
    %192 = vector.load %arg11[%c0_62, %c0_63, %c0_64] : memref<2x64x256xf32, #tpu.memory_space<vmem>>, vector<1x64x256xf32>
    %193 = vector.shape_cast %192 : vector<1x64x256xf32> to vector<64x256xf32>
    %cst_65 = arith.constant dense<0.000000e+00> : vector<8x256xf32>
    %194 = tpu.matmul %191, %193, %cst_65 {dimension_numbers = #tpu.dot_dimension_numbers<[1], [0], [0], [1], [0, 0, 1, 1], [], []>} : vector<8x64xf32>, vector<64x256xf32>, vector<8x256xf32> -> vector<8x256xf32>
    %195 = vector.extract_strided_slice %194 {offsets = [0, 0], sizes = [8, 128], strides = [1, 1]} : vector<8x256xf32> to vector<8x128xf32>
    %196 = vector.extract_strided_slice %194 {offsets = [0, 128], sizes = [8, 128], strides = [1, 1]} : vector<8x256xf32> to vector<8x128xf32>
    %197 = arith.negf %195 : vector<8x128xf32>
    %198 = math.exp %197 : vector<8x128xf32>
    %cst_66 = arith.constant 1.000000e+00 : f32
    %199 = vector.broadcast %cst_66 : f32 to vector<8x128xf32>
    %200 = arith.addf %199, %198 : vector<8x128xf32>
    %201 = arith.divf %199, %200 : vector<8x128xf32>
    %202 = arith.mulf %195, %201 : vector<8x128xf32>
    %203 = arith.mulf %202, %196 : vector<8x128xf32>
    %c0_67 = arith.constant 0 : index
    %c0_68 = arith.constant 0 : index
    %c0_69 = arith.constant 0 : index
    %204 = vector.load %arg12[%c0_67, %c0_68, %c0_69] : memref<2x128x64xf32, #tpu.memory_space<vmem>>, vector<1x128x64xf32>
    %205 = vector.shape_cast %204 : vector<1x128x64xf32> to vector<128x64xf32>
    %cst_70 = arith.constant dense<0.000000e+00> : vector<8x64xf32>
    %206 = tpu.matmul %203, %205, %cst_70 {dimension_numbers = #tpu.dot_dimension_numbers<[1], [0], [0], [1], [0, 0, 1, 1], [], []>} : vector<8x128xf32>, vector<128x64xf32>, vector<8x64xf32> -> vector<8x64xf32>
    %207 = arith.addf %177, %206 : vector<8x64xf32>
    %c1 = arith.constant 1 : index
    %c0_71 = arith.constant 0 : index
    %c0_72 = arith.constant 0 : index
    %208 = vector.load %arg6[%c1, %c0_71, %c0_72] : memref<2x1x64xf32, #tpu.memory_space<vmem>>, vector<1x1x64xf32>
    %209 = vector.shape_cast %208 : vector<1x1x64xf32> to vector<1x64xf32>
    %210 = arith.mulf %207, %207 : vector<8x64xf32>
    %cst_73 = arith.constant dense<0.000000e+00> : vector<8xf32>
    %211 = vector.multi_reduction <add>, %210, %cst_73 [1] : vector<8x64xf32> to vector<8xf32>
    %212 = vector.shape_cast %211 : vector<8xf32> to vector<8x1xf32>
    %cst_74 = arith.constant 6.400000e+01 : f32
    %213 = vector.broadcast %cst_74 : f32 to vector<8x1xf32>
    %214 = arith.divf %212, %213 : vector<8x1xf32>
    %cst_75 = arith.constant 9.99999997E-7 : f32
    %215 = vector.broadcast %cst_75 : f32 to vector<8x1xf32>
    %216 = arith.addf %214, %215 : vector<8x1xf32>
    %217 = math.rsqrt %216 : vector<8x1xf32>
    %218 = vector.broadcast %217 : vector<8x1xf32> to vector<8x64xf32>
    %219 = arith.mulf %207, %218 : vector<8x64xf32>
    %220 = vector.broadcast %209 : vector<1x64xf32> to vector<8x64xf32>
    %221 = arith.mulf %219, %220 : vector<8x64xf32>
    %c1_76 = arith.constant 1 : index
    %c0_77 = arith.constant 0 : index
    %c0_78 = arith.constant 0 : index
    %222 = vector.load %arg8[%c1_76, %c0_77, %c0_78] : memref<2x64x192xf32, #tpu.memory_space<vmem>>, vector<1x64x192xf32>
    %223 = vector.shape_cast %222 : vector<1x64x192xf32> to vector<64x192xf32>
    %cst_79 = arith.constant dense<0.000000e+00> : vector<8x192xf32>
    %224 = tpu.matmul %221, %223, %cst_79 {dimension_numbers = #tpu.dot_dimension_numbers<[1], [0], [0], [1], [0, 0, 1, 1], [], []>} : vector<8x64xf32>, vector<64x192xf32>, vector<8x192xf32> -> vector<8x192xf32>
    %c1_80 = arith.constant 1 : index
    %c0_81 = arith.constant 0 : index
    %c0_82 = arith.constant 0 : index
    %225 = vector.load %arg9[%c1_80, %c0_81, %c0_82] : memref<2x1x192xf32, #tpu.memory_space<vmem>>, vector<1x1x192xf32>
    %226 = vector.shape_cast %225 : vector<1x1x192xf32> to vector<1x192xf32>
    %227 = vector.broadcast %226 : vector<1x192xf32> to vector<8x192xf32>
    %228 = arith.addf %224, %227 : vector<8x192xf32>
    %229 = vector.extract_strided_slice %228 {offsets = [0, 0], sizes = [8, 16], strides = [1, 1]} : vector<8x192xf32> to vector<8x16xf32>
    %230 = vector.extract_strided_slice %228 {offsets = [0, 64], sizes = [8, 16], strides = [1, 1]} : vector<8x192xf32> to vector<8x16xf32>
    %231 = vector.extract_strided_slice %228 {offsets = [0, 128], sizes = [8, 16], strides = [1, 1]} : vector<8x192xf32> to vector<8x16xf32>
    %232 = arith.mulf %229, %2 : vector<8x16xf32>
    %233 = vector.extract_strided_slice %229 {offsets = [0, 8], sizes = [8, 8], strides = [1, 1]} : vector<8x16xf32> to vector<8x8xf32>
    %cst_83 = arith.constant 0.000000e+00 : f32
    %234 = vector.broadcast %cst_83 : f32 to vector<8x8xf32>
    %235 = arith.subf %234, %233 : vector<8x8xf32>
    %236 = vector.extract_strided_slice %229 {offsets = [0, 0], sizes = [8, 8], strides = [1, 1]} : vector<8x16xf32> to vector<8x8xf32>
    %237 = tpu.concatenate %235, %236 in 1 : vector<8x8xf32>, vector<8x8xf32> -> vector<8x16xf32>
    %238 = arith.mulf %237, %3 : vector<8x16xf32>
    %239 = arith.addf %232, %238 : vector<8x16xf32>
    %240 = arith.mulf %230, %2 : vector<8x16xf32>
    %241 = vector.extract_strided_slice %230 {offsets = [0, 8], sizes = [8, 8], strides = [1, 1]} : vector<8x16xf32> to vector<8x8xf32>
    %cst_84 = arith.constant 0.000000e+00 : f32
    %242 = vector.broadcast %cst_84 : f32 to vector<8x8xf32>
    %243 = arith.subf %242, %241 : vector<8x8xf32>
    %244 = vector.extract_strided_slice %230 {offsets = [0, 0], sizes = [8, 8], strides = [1, 1]} : vector<8x16xf32> to vector<8x8xf32>
    %245 = tpu.concatenate %243, %244 in 1 : vector<8x8xf32>, vector<8x8xf32> -> vector<8x16xf32>
    %246 = arith.mulf %245, %3 : vector<8x16xf32>
    %247 = arith.addf %240, %246 : vector<8x16xf32>
    %cst_85 = arith.constant dense<0.000000e+00> : vector<8x8xf32>
    %248 = tpu.matmul %239, %247, %cst_85 {dimension_numbers = #tpu.dot_dimension_numbers<[1], [1], [0], [0], [0, 0, 1, 0], [], []>} : vector<8x16xf32>, vector<8x16xf32>, vector<8x8xf32> -> vector<8x8xf32>
    %cst_86 = arith.constant 2.500000e-01 : f32
    %249 = vector.broadcast %cst_86 : f32 to vector<8x8xf32>
    %250 = arith.mulf %248, %249 : vector<8x8xf32>
    %251 = arith.addf %250, %15 : vector<8x8xf32>
    %cst_87 = arith.constant dense<0xFF800000> : vector<8xf32>
    %252 = vector.multi_reduction <maximumf>, %251, %cst_87 [1] : vector<8x8xf32> to vector<8xf32>
    %253 = vector.shape_cast %252 : vector<8xf32> to vector<8x1xf32>
    %254 = vector.broadcast %253 : vector<8x1xf32> to vector<8x8xf32>
    %255 = arith.subf %251, %254 : vector<8x8xf32>
    %256 = math.exp %255 : vector<8x8xf32>
    %cst_88 = arith.constant dense<0.000000e+00> : vector<8xf32>
    %257 = vector.multi_reduction <add>, %256, %cst_88 [1] : vector<8x8xf32> to vector<8xf32>
    %258 = vector.shape_cast %257 : vector<8xf32> to vector<8x1xf32>
    %259 = tpu.reciprocal %258 {approx = true} : vector<8x1xf32> -> vector<8x1xf32>
    %260 = vector.broadcast %259 : vector<8x1xf32> to vector<8x8xf32>
    %261 = arith.mulf %256, %260 : vector<8x8xf32>
    %cst_89 = arith.constant dense<0.000000e+00> : vector<8x16xf32>
    %262 = tpu.matmul %261, %231, %cst_89 {dimension_numbers = #tpu.dot_dimension_numbers<[1], [0], [0], [1], [0, 0, 1, 1], [], []>} : vector<8x8xf32>, vector<8x16xf32>, vector<8x16xf32> -> vector<8x16xf32>
    %263 = vector.extract_strided_slice %228 {offsets = [0, 16], sizes = [8, 16], strides = [1, 1]} : vector<8x192xf32> to vector<8x16xf32>
    %264 = vector.extract_strided_slice %228 {offsets = [0, 80], sizes = [8, 16], strides = [1, 1]} : vector<8x192xf32> to vector<8x16xf32>
    %265 = vector.extract_strided_slice %228 {offsets = [0, 144], sizes = [8, 16], strides = [1, 1]} : vector<8x192xf32> to vector<8x16xf32>
    %266 = arith.mulf %263, %2 : vector<8x16xf32>
    %267 = vector.extract_strided_slice %263 {offsets = [0, 8], sizes = [8, 8], strides = [1, 1]} : vector<8x16xf32> to vector<8x8xf32>
    %cst_90 = arith.constant 0.000000e+00 : f32
    %268 = vector.broadcast %cst_90 : f32 to vector<8x8xf32>
    %269 = arith.subf %268, %267 : vector<8x8xf32>
    %270 = vector.extract_strided_slice %263 {offsets = [0, 0], sizes = [8, 8], strides = [1, 1]} : vector<8x16xf32> to vector<8x8xf32>
    %271 = tpu.concatenate %269, %270 in 1 : vector<8x8xf32>, vector<8x8xf32> -> vector<8x16xf32>
    %272 = arith.mulf %271, %3 : vector<8x16xf32>
    %273 = arith.addf %266, %272 : vector<8x16xf32>
    %274 = arith.mulf %264, %2 : vector<8x16xf32>
    %275 = vector.extract_strided_slice %264 {offsets = [0, 8], sizes = [8, 8], strides = [1, 1]} : vector<8x16xf32> to vector<8x8xf32>
    %cst_91 = arith.constant 0.000000e+00 : f32
    %276 = vector.broadcast %cst_91 : f32 to vector<8x8xf32>
    %277 = arith.subf %276, %275 : vector<8x8xf32>
    %278 = vector.extract_strided_slice %264 {offsets = [0, 0], sizes = [8, 8], strides = [1, 1]} : vector<8x16xf32> to vector<8x8xf32>
    %279 = tpu.concatenate %277, %278 in 1 : vector<8x8xf32>, vector<8x8xf32> -> vector<8x16xf32>
    %280 = arith.mulf %279, %3 : vector<8x16xf32>
    %281 = arith.addf %274, %280 : vector<8x16xf32>
    %cst_92 = arith.constant dense<0.000000e+00> : vector<8x8xf32>
    %282 = tpu.matmul %273, %281, %cst_92 {dimension_numbers = #tpu.dot_dimension_numbers<[1], [1], [0], [0], [0, 0, 1, 0], [], []>} : vector<8x16xf32>, vector<8x16xf32>, vector<8x8xf32> -> vector<8x8xf32>
    %cst_93 = arith.constant 2.500000e-01 : f32
    %283 = vector.broadcast %cst_93 : f32 to vector<8x8xf32>
    %284 = arith.mulf %282, %283 : vector<8x8xf32>
    %285 = arith.addf %284, %15 : vector<8x8xf32>
    %cst_94 = arith.constant dense<0xFF800000> : vector<8xf32>
    %286 = vector.multi_reduction <maximumf>, %285, %cst_94 [1] : vector<8x8xf32> to vector<8xf32>
    %287 = vector.shape_cast %286 : vector<8xf32> to vector<8x1xf32>
    %288 = vector.broadcast %287 : vector<8x1xf32> to vector<8x8xf32>
    %289 = arith.subf %285, %288 : vector<8x8xf32>
    %290 = math.exp %289 : vector<8x8xf32>
    %cst_95 = arith.constant dense<0.000000e+00> : vector<8xf32>
    %291 = vector.multi_reduction <add>, %290, %cst_95 [1] : vector<8x8xf32> to vector<8xf32>
    %292 = vector.shape_cast %291 : vector<8xf32> to vector<8x1xf32>
    %293 = tpu.reciprocal %292 {approx = true} : vector<8x1xf32> -> vector<8x1xf32>
    %294 = vector.broadcast %293 : vector<8x1xf32> to vector<8x8xf32>
    %295 = arith.mulf %290, %294 : vector<8x8xf32>
    %cst_96 = arith.constant dense<0.000000e+00> : vector<8x16xf32>
    %296 = tpu.matmul %295, %265, %cst_96 {dimension_numbers = #tpu.dot_dimension_numbers<[1], [0], [0], [1], [0, 0, 1, 1], [], []>} : vector<8x8xf32>, vector<8x16xf32>, vector<8x16xf32> -> vector<8x16xf32>
    %297 = vector.extract_strided_slice %228 {offsets = [0, 32], sizes = [8, 16], strides = [1, 1]} : vector<8x192xf32> to vector<8x16xf32>
    %298 = vector.extract_strided_slice %228 {offsets = [0, 96], sizes = [8, 16], strides = [1, 1]} : vector<8x192xf32> to vector<8x16xf32>
    %299 = vector.extract_strided_slice %228 {offsets = [0, 160], sizes = [8, 16], strides = [1, 1]} : vector<8x192xf32> to vector<8x16xf32>
    %300 = arith.mulf %297, %2 : vector<8x16xf32>
    %301 = vector.extract_strided_slice %297 {offsets = [0, 8], sizes = [8, 8], strides = [1, 1]} : vector<8x16xf32> to vector<8x8xf32>
    %cst_97 = arith.constant 0.000000e+00 : f32
    %302 = vector.broadcast %cst_97 : f32 to vector<8x8xf32>
    %303 = arith.subf %302, %301 : vector<8x8xf32>
    %304 = vector.extract_strided_slice %297 {offsets = [0, 0], sizes = [8, 8], strides = [1, 1]} : vector<8x16xf32> to vector<8x8xf32>
    %305 = tpu.concatenate %303, %304 in 1 : vector<8x8xf32>, vector<8x8xf32> -> vector<8x16xf32>
    %306 = arith.mulf %305, %3 : vector<8x16xf32>
    %307 = arith.addf %300, %306 : vector<8x16xf32>
    %308 = arith.mulf %298, %2 : vector<8x16xf32>
    %309 = vector.extract_strided_slice %298 {offsets = [0, 8], sizes = [8, 8], strides = [1, 1]} : vector<8x16xf32> to vector<8x8xf32>
    %cst_98 = arith.constant 0.000000e+00 : f32
    %310 = vector.broadcast %cst_98 : f32 to vector<8x8xf32>
    %311 = arith.subf %310, %309 : vector<8x8xf32>
    %312 = vector.extract_strided_slice %298 {offsets = [0, 0], sizes = [8, 8], strides = [1, 1]} : vector<8x16xf32> to vector<8x8xf32>
    %313 = tpu.concatenate %311, %312 in 1 : vector<8x8xf32>, vector<8x8xf32> -> vector<8x16xf32>
    %314 = arith.mulf %313, %3 : vector<8x16xf32>
    %315 = arith.addf %308, %314 : vector<8x16xf32>
    %cst_99 = arith.constant dense<0.000000e+00> : vector<8x8xf32>
    %316 = tpu.matmul %307, %315, %cst_99 {dimension_numbers = #tpu.dot_dimension_numbers<[1], [1], [0], [0], [0, 0, 1, 0], [], []>} : vector<8x16xf32>, vector<8x16xf32>, vector<8x8xf32> -> vector<8x8xf32>
    %cst_100 = arith.constant 2.500000e-01 : f32
    %317 = vector.broadcast %cst_100 : f32 to vector<8x8xf32>
    %318 = arith.mulf %316, %317 : vector<8x8xf32>
    %319 = arith.addf %318, %15 : vector<8x8xf32>
    %cst_101 = arith.constant dense<0xFF800000> : vector<8xf32>
    %320 = vector.multi_reduction <maximumf>, %319, %cst_101 [1] : vector<8x8xf32> to vector<8xf32>
    %321 = vector.shape_cast %320 : vector<8xf32> to vector<8x1xf32>
    %322 = vector.broadcast %321 : vector<8x1xf32> to vector<8x8xf32>
    %323 = arith.subf %319, %322 : vector<8x8xf32>
    %324 = math.exp %323 : vector<8x8xf32>
    %cst_102 = arith.constant dense<0.000000e+00> : vector<8xf32>
    %325 = vector.multi_reduction <add>, %324, %cst_102 [1] : vector<8x8xf32> to vector<8xf32>
    %326 = vector.shape_cast %325 : vector<8xf32> to vector<8x1xf32>
    %327 = tpu.reciprocal %326 {approx = true} : vector<8x1xf32> -> vector<8x1xf32>
    %328 = vector.broadcast %327 : vector<8x1xf32> to vector<8x8xf32>
    %329 = arith.mulf %324, %328 : vector<8x8xf32>
    %cst_103 = arith.constant dense<0.000000e+00> : vector<8x16xf32>
    %330 = tpu.matmul %329, %299, %cst_103 {dimension_numbers = #tpu.dot_dimension_numbers<[1], [0], [0], [1], [0, 0, 1, 1], [], []>} : vector<8x8xf32>, vector<8x16xf32>, vector<8x16xf32> -> vector<8x16xf32>
    %331 = vector.extract_strided_slice %228 {offsets = [0, 48], sizes = [8, 16], strides = [1, 1]} : vector<8x192xf32> to vector<8x16xf32>
    %332 = vector.extract_strided_slice %228 {offsets = [0, 112], sizes = [8, 16], strides = [1, 1]} : vector<8x192xf32> to vector<8x16xf32>
    %333 = vector.extract_strided_slice %228 {offsets = [0, 176], sizes = [8, 16], strides = [1, 1]} : vector<8x192xf32> to vector<8x16xf32>
    %334 = arith.mulf %331, %2 : vector<8x16xf32>
    %335 = vector.extract_strided_slice %331 {offsets = [0, 8], sizes = [8, 8], strides = [1, 1]} : vector<8x16xf32> to vector<8x8xf32>
    %cst_104 = arith.constant 0.000000e+00 : f32
    %336 = vector.broadcast %cst_104 : f32 to vector<8x8xf32>
    %337 = arith.subf %336, %335 : vector<8x8xf32>
    %338 = vector.extract_strided_slice %331 {offsets = [0, 0], sizes = [8, 8], strides = [1, 1]} : vector<8x16xf32> to vector<8x8xf32>
    %339 = tpu.concatenate %337, %338 in 1 : vector<8x8xf32>, vector<8x8xf32> -> vector<8x16xf32>
    %340 = arith.mulf %339, %3 : vector<8x16xf32>
    %341 = arith.addf %334, %340 : vector<8x16xf32>
    %342 = arith.mulf %332, %2 : vector<8x16xf32>
    %343 = vector.extract_strided_slice %332 {offsets = [0, 8], sizes = [8, 8], strides = [1, 1]} : vector<8x16xf32> to vector<8x8xf32>
    %cst_105 = arith.constant 0.000000e+00 : f32
    %344 = vector.broadcast %cst_105 : f32 to vector<8x8xf32>
    %345 = arith.subf %344, %343 : vector<8x8xf32>
    %346 = vector.extract_strided_slice %332 {offsets = [0, 0], sizes = [8, 8], strides = [1, 1]} : vector<8x16xf32> to vector<8x8xf32>
    %347 = tpu.concatenate %345, %346 in 1 : vector<8x8xf32>, vector<8x8xf32> -> vector<8x16xf32>
    %348 = arith.mulf %347, %3 : vector<8x16xf32>
    %349 = arith.addf %342, %348 : vector<8x16xf32>
    %cst_106 = arith.constant dense<0.000000e+00> : vector<8x8xf32>
    %350 = tpu.matmul %341, %349, %cst_106 {dimension_numbers = #tpu.dot_dimension_numbers<[1], [1], [0], [0], [0, 0, 1, 0], [], []>} : vector<8x16xf32>, vector<8x16xf32>, vector<8x8xf32> -> vector<8x8xf32>
    %cst_107 = arith.constant 2.500000e-01 : f32
    %351 = vector.broadcast %cst_107 : f32 to vector<8x8xf32>
    %352 = arith.mulf %350, %351 : vector<8x8xf32>
    %353 = arith.addf %352, %15 : vector<8x8xf32>
    %cst_108 = arith.constant dense<0xFF800000> : vector<8xf32>
    %354 = vector.multi_reduction <maximumf>, %353, %cst_108 [1] : vector<8x8xf32> to vector<8xf32>
    %355 = vector.shape_cast %354 : vector<8xf32> to vector<8x1xf32>
    %356 = vector.broadcast %355 : vector<8x1xf32> to vector<8x8xf32>
    %357 = arith.subf %353, %356 : vector<8x8xf32>
    %358 = math.exp %357 : vector<8x8xf32>
    %cst_109 = arith.constant dense<0.000000e+00> : vector<8xf32>
    %359 = vector.multi_reduction <add>, %358, %cst_109 [1] : vector<8x8xf32> to vector<8xf32>
    %360 = vector.shape_cast %359 : vector<8xf32> to vector<8x1xf32>
    %361 = tpu.reciprocal %360 {approx = true} : vector<8x1xf32> -> vector<8x1xf32>
    %362 = vector.broadcast %361 : vector<8x1xf32> to vector<8x8xf32>
    %363 = arith.mulf %358, %362 : vector<8x8xf32>
    %cst_110 = arith.constant dense<0.000000e+00> : vector<8x16xf32>
    %364 = tpu.matmul %363, %333, %cst_110 {dimension_numbers = #tpu.dot_dimension_numbers<[1], [0], [0], [1], [0, 0, 1, 1], [], []>} : vector<8x8xf32>, vector<8x16xf32>, vector<8x16xf32> -> vector<8x16xf32>
    %365 = tpu.concatenate %262, %296, %330, %364 in 1 : vector<8x16xf32>, vector<8x16xf32>, vector<8x16xf32>, vector<8x16xf32> -> vector<8x64xf32>
    %c1_111 = arith.constant 1 : index
    %c0_112 = arith.constant 0 : index
    %c0_113 = arith.constant 0 : index
    %366 = vector.load %arg10[%c1_111, %c0_112, %c0_113] : memref<2x64x64xf32, #tpu.memory_space<vmem>>, vector<1x64x64xf32>
    %367 = vector.shape_cast %366 : vector<1x64x64xf32> to vector<64x64xf32>
    %cst_114 = arith.constant dense<0.000000e+00> : vector<8x64xf32>
    %368 = tpu.matmul %365, %367, %cst_114 {dimension_numbers = #tpu.dot_dimension_numbers<[1], [0], [0], [1], [0, 0, 1, 1], [], []>} : vector<8x64xf32>, vector<64x64xf32>, vector<8x64xf32> -> vector<8x64xf32>
    %369 = arith.addf %207, %368 : vector<8x64xf32>
    %c1_115 = arith.constant 1 : index
    %c0_116 = arith.constant 0 : index
    %c0_117 = arith.constant 0 : index
    %370 = vector.load %arg7[%c1_115, %c0_116, %c0_117] : memref<2x1x64xf32, #tpu.memory_space<vmem>>, vector<1x1x64xf32>
    %371 = vector.shape_cast %370 : vector<1x1x64xf32> to vector<1x64xf32>
    %372 = arith.mulf %369, %369 : vector<8x64xf32>
    %cst_118 = arith.constant dense<0.000000e+00> : vector<8xf32>
    %373 = vector.multi_reduction <add>, %372, %cst_118 [1] : vector<8x64xf32> to vector<8xf32>
    %374 = vector.shape_cast %373 : vector<8xf32> to vector<8x1xf32>
    %cst_119 = arith.constant 6.400000e+01 : f32
    %375 = vector.broadcast %cst_119 : f32 to vector<8x1xf32>
    %376 = arith.divf %374, %375 : vector<8x1xf32>
    %cst_120 = arith.constant 9.99999997E-7 : f32
    %377 = vector.broadcast %cst_120 : f32 to vector<8x1xf32>
    %378 = arith.addf %376, %377 : vector<8x1xf32>
    %379 = math.rsqrt %378 : vector<8x1xf32>
    %380 = vector.broadcast %379 : vector<8x1xf32> to vector<8x64xf32>
    %381 = arith.mulf %369, %380 : vector<8x64xf32>
    %382 = vector.broadcast %371 : vector<1x64xf32> to vector<8x64xf32>
    %383 = arith.mulf %381, %382 : vector<8x64xf32>
    %c1_121 = arith.constant 1 : index
    %c0_122 = arith.constant 0 : index
    %c0_123 = arith.constant 0 : index
    %384 = vector.load %arg11[%c1_121, %c0_122, %c0_123] : memref<2x64x256xf32, #tpu.memory_space<vmem>>, vector<1x64x256xf32>
    %385 = vector.shape_cast %384 : vector<1x64x256xf32> to vector<64x256xf32>
    %cst_124 = arith.constant dense<0.000000e+00> : vector<8x256xf32>
    %386 = tpu.matmul %383, %385, %cst_124 {dimension_numbers = #tpu.dot_dimension_numbers<[1], [0], [0], [1], [0, 0, 1, 1], [], []>} : vector<8x64xf32>, vector<64x256xf32>, vector<8x256xf32> -> vector<8x256xf32>
    %387 = vector.extract_strided_slice %386 {offsets = [0, 0], sizes = [8, 128], strides = [1, 1]} : vector<8x256xf32> to vector<8x128xf32>
    %388 = vector.extract_strided_slice %386 {offsets = [0, 128], sizes = [8, 128], strides = [1, 1]} : vector<8x256xf32> to vector<8x128xf32>
    %389 = arith.negf %387 : vector<8x128xf32>
    %390 = math.exp %389 : vector<8x128xf32>
    %cst_125 = arith.constant 1.000000e+00 : f32
    %391 = vector.broadcast %cst_125 : f32 to vector<8x128xf32>
    %392 = arith.addf %391, %390 : vector<8x128xf32>
    %393 = arith.divf %391, %392 : vector<8x128xf32>
    %394 = arith.mulf %387, %393 : vector<8x128xf32>
    %395 = arith.mulf %394, %388 : vector<8x128xf32>
    %c1_126 = arith.constant 1 : index
    %c0_127 = arith.constant 0 : index
    %c0_128 = arith.constant 0 : index
    %396 = vector.load %arg12[%c1_126, %c0_127, %c0_128] : memref<2x128x64xf32, #tpu.memory_space<vmem>>, vector<1x128x64xf32>
    %397 = vector.shape_cast %396 : vector<1x128x64xf32> to vector<128x64xf32>
    %cst_129 = arith.constant dense<0.000000e+00> : vector<8x64xf32>
    %398 = tpu.matmul %395, %397, %cst_129 {dimension_numbers = #tpu.dot_dimension_numbers<[1], [0], [0], [1], [0, 0, 1, 1], [], []>} : vector<8x128xf32>, vector<128x64xf32>, vector<8x64xf32> -> vector<8x64xf32>
    %399 = arith.addf %369, %398 : vector<8x64xf32>
    %c0_130 = arith.constant 0 : index
    %c0_131 = arith.constant 0 : index
    %400 = vector.load %arg13[%c0_130, %c0_131] : memref<1x64xf32, #tpu.memory_space<vmem>>, vector<1x64xf32>
    %401 = arith.mulf %399, %399 : vector<8x64xf32>
    %cst_132 = arith.constant dense<0.000000e+00> : vector<8xf32>
    %402 = vector.multi_reduction <add>, %401, %cst_132 [1] : vector<8x64xf32> to vector<8xf32>
    %403 = vector.shape_cast %402 : vector<8xf32> to vector<8x1xf32>
    %cst_133 = arith.constant 6.400000e+01 : f32
    %404 = vector.broadcast %cst_133 : f32 to vector<8x1xf32>
    %405 = arith.divf %403, %404 : vector<8x1xf32>
    %cst_134 = arith.constant 9.99999997E-7 : f32
    %406 = vector.broadcast %cst_134 : f32 to vector<8x1xf32>
    %407 = arith.addf %405, %406 : vector<8x1xf32>
    %408 = math.rsqrt %407 : vector<8x1xf32>
    %409 = vector.broadcast %408 : vector<8x1xf32> to vector<8x64xf32>
    %410 = arith.mulf %399, %409 : vector<8x64xf32>
    %411 = vector.broadcast %400 : vector<1x64xf32> to vector<8x64xf32>
    %412 = arith.mulf %410, %411 : vector<8x64xf32>
    %c0_135 = arith.constant 0 : index
    %c0_136 = arith.constant 0 : index
    %413 = vector.load %arg14[%c0_135, %c0_136] : memref<64x256xf32, #tpu.memory_space<vmem>>, vector<64x256xf32>
    %cst_137 = arith.constant dense<0.000000e+00> : vector<8x256xf32>
    %414 = tpu.matmul %412, %413, %cst_137 {dimension_numbers = #tpu.dot_dimension_numbers<[1], [0], [0], [1], [0, 0, 1, 1], [], []>} : vector<8x64xf32>, vector<64x256xf32>, vector<8x256xf32> -> vector<8x256xf32>
    %c0_138 = arith.constant 0 : index
    %c0_139 = arith.constant 0 : index
    %c0_140 = arith.constant 0 : index
    %415 = vector.load %arg15[%c0_138, %c0_139, %c0_140] : memref<1x8x256xf32, #tpu.memory_space<vmem>>, vector<1x8x256xf32>
    %416 = vector.shape_cast %415 : vector<1x8x256xf32> to vector<8x256xf32>
    %417 = vector.shape_cast %414 : vector<8x256xf32> to vector<1x8x256xf32>
    tpu.vector_store %arg15[%c0_138, %c0_139, %c0_140], %417 {strides = array<i32>} : memref<1x8x256xf32, #tpu.memory_space<vmem>>, vector<1x8x256xf32>,
    %c0_141 = arith.constant 0 : index
    %c0_142 = arith.constant 0 : index
    %c0_143 = arith.constant 0 : index
    %418 = vector.load %arg3[%c0_141, %c0_142, %c0_143] : memref<1x8x1xi32, #tpu.memory_space<vmem>>, vector<1x8x1xi32>
    %419 = vector.shape_cast %418 : vector<1x8x1xi32> to vector<8x1xi32>
    %cst_144 = arith.constant dense<0xFF800000> : vector<8xf32>
    %420 = vector.multi_reduction <maximumf>, %414, %cst_144 [1] : vector<8x256xf32> to vector<8xf32>
    %421 = vector.shape_cast %420 : vector<8xf32> to vector<8x1xf32>
    %422 = vector.broadcast %421 : vector<8x1xf32> to vector<8x256xf32>
    %423 = arith.subf %414, %422 : vector<8x256xf32>
    %424 = math.exp %423 : vector<8x256xf32>
    %cst_145 = arith.constant dense<0.000000e+00> : vector<8xf32>
    %425 = vector.multi_reduction <add>, %424, %cst_145 [1] : vector<8x256xf32> to vector<8xf32>
    %426 = vector.shape_cast %425 : vector<8xf32> to vector<8x1xf32>
    %427 = math.log %426 : vector<8x1xf32>
    %428 = arith.addf %427, %421 : vector<8x1xf32>
    %429 = tpu.iota {dimensions = array<i32: 1>} : vector<8x256xi32>
    %430 = vector.broadcast %419 : vector<8x1xi32> to vector<8x256xi32>
    %431 = arith.cmpi eq, %429, %430 : vector<8x256xi32>
    %432 = arith.extui %431 : vector<8x256xi1> to vector<8x256xi32>
    %433 = arith.sitofp %432 : vector<8x256xi32> to vector<8x256xf32>
    %434 = arith.mulf %414, %433 : vector<8x256xf32>
    %cst_146 = arith.constant dense<0.000000e+00> : vector<8xf32>
    %435 = vector.multi_reduction <add>, %434, %cst_146 [1] : vector<8x256xf32> to vector<8xf32>
    %436 = vector.shape_cast %435 : vector<8xf32> to vector<8x1xf32>
    %c-100_i32 = arith.constant -100 : i32
    %437 = vector.broadcast %c-100_i32 : i32 to vector<8x1xi32>
    %438 = arith.cmpi ne, %419, %437 : vector<8x1xi32>
    %439 = arith.extui %438 : vector<8x1xi1> to vector<8x1xi32>
    %440 = arith.sitofp %439 : vector<8x1xi32> to vector<8x1xf32>
    %441 = arith.subf %428, %436 : vector<8x1xf32>
    %442 = arith.mulf %441, %440 : vector<8x1xf32>
    %cst_147 = arith.constant dense<0.000000e+00> : vector<1xf32>
    %443 = vector.multi_reduction <add>, %442, %cst_147 [0] : vector<8x1xf32> to vector<1xf32>
    %444 = vector.shape_cast %443 : vector<1xf32> to vector<1x1xf32>
    %c0_148 = arith.constant 0 : index
    %c0_149 = arith.constant 0 : index
    %c0_150 = arith.constant 0 : index
    %445 = vector.load %arg16[%c0_148, %c0_149, %c0_150] : memref<1x1x1xf32, #tpu.memory_space<vmem>>, vector<1x1x1xf32>
    %446 = vector.shape_cast %445 : vector<1x1x1xf32> to vector<1x1xf32>
    %447 = vector.shape_cast %444 : vector<1x1xf32> to vector<1x1x1xf32>
    tpu.vector_store %arg16[%c0_148, %c0_149, %c0_150], %447 {strides = array<i32>} : memref<1x1x1xf32, #tpu.memory_space<vmem>>, vector<1x1x1xf32>,
    %cst_151 = arith.constant dense<0.000000e+00> : vector<1xf32>
    %448 = vector.multi_reduction <add>, %440, %cst_151 [0] : vector<8x1xf32> to vector<1xf32>
    %449 = vector.shape_cast %448 : vector<1xf32> to vector<1x1xf32>
    %c0_152 = arith.constant 0 : index
    %c0_153 = arith.constant 0 : index
    %c0_154 = arith.constant 0 : index
    %450 = vector.load %arg17[%c0_152, %c0_153, %c0_154] : memref<1x1x1xf32, #tpu.memory_space<vmem>>, vector<1x1x1xf32>
    %451 = vector.shape_cast %450 : vector<1x1x1xf32> to vector<1x1xf32>
    %452 = vector.shape_cast %449 : vector<1x1xf32> to vector<1x1x1xf32>
    tpu.vector_store %arg17[%c0_152, %c0_153, %c0_154], %452 {strides = array<i32>} : memref<1x1x1xf32, #tpu.memory_space<vmem>>, vector<1x1x1xf32>,
    return
  }
  func.func @transform_0(%arg0: i32) -> (i32, i32, i32) {
    %c0_i32 = arith.constant 0 : i32
    %c0_i32_0 = arith.constant 0 : i32
    %c0_i32_1 = arith.constant 0 : i32
    return %arg0, %c0_i32, %c0_i32_0 : i32, i32, i32
  }
  func.func @transform_1(%arg0: i32) -> (i32, i32, i32) {
    %c0_i32 = arith.constant 0 : i32
    %c0_i32_0 = arith.constant 0 : i32
    %c0_i32_1 = arith.constant 0 : i32
    return %arg0, %c0_i32, %c0_i32_0 : i32, i32, i32
  }
  func.func @transform_2(%arg0: i32) -> (i32, i32, i32) {
    %c0_i32 = arith.constant 0 : i32
    %c0_i32_0 = arith.constant 0 : i32
    %c0_i32_1 = arith.constant 0 : i32
    return %arg0, %c0_i32, %c0_i32_0 : i32, i32, i32
  }
  func.func @transform_3(%arg0: i32) -> (i32, i32) {
    %c0_i32 = arith.constant 0 : i32
    %c0_i32_0 = arith.constant 0 : i32
    %c0_i32_1 = arith.constant 0 : i32
    return %c0_i32, %c0_i32_0 : i32, i32
  }
  func.func @transform_4(%arg0: i32) -> (i32, i32) {
    %c0_i32 = arith.constant 0 : i32
    %c0_i32_0 = arith.constant 0 : i32
    %c0_i32_1 = arith.constant 0 : i32
    return %c0_i32, %c0_i32_0 : i32, i32
  }
  func.func @transform_5(%arg0: i32) -> (i32, i32, i32) {
    %c0_i32 = arith.constant 0 : i32
    %c0_i32_0 = arith.constant 0 : i32
    %c0_i32_1 = arith.constant 0 : i32
    %c0_i32_2 = arith.constant 0 : i32
    return %c0_i32, %c0_i32_0, %c0_i32_1 : i32, i32, i32
  }
  func.func @transform_6(%arg0: i32) -> (i32, i32, i32) {
    %c0_i32 = arith.constant 0 : i32
    %c0_i32_0 = arith.constant 0 : i32
    %c0_i32_1 = arith.constant 0 : i32
    %c0_i32_2 = arith.constant 0 : i32
    return %c0_i32, %c0_i32_0, %c0_i32_1 : i32, i32, i32
  }
  func.func @transform_7(%arg0: i32) -> (i32, i32, i32) {
    %c0_i32 = arith.constant 0 : i32
    %c0_i32_0 = arith.constant 0 : i32
    %c0_i32_1 = arith.constant 0 : i32
    %c0_i32_2 = arith.constant 0 : i32
    return %c0_i32, %c0_i32_0, %c0_i32_1 : i32, i32, i32
  }
  func.func @transform_8(%arg0: i32) -> (i32, i32, i32) {
    %c0_i32 = arith.constant 0 : i32
    %c0_i32_0 = arith.constant 0 : i32
    %c0_i32_1 = arith.constant 0 : i32
    %c0_i32_2 = arith.constant 0 : i32
    return %c0_i32, %c0_i32_0, %c0_i32_1 : i32, i32, i32
  }
  func.func @transform_9(%arg0: i32) -> (i32, i32, i32) {
    %c0_i32 = arith.constant 0 : i32
    %c0_i32_0 = arith.constant 0 : i32
    %c0_i32_1 = arith.constant 0 : i32
    %c0_i32_2 = arith.constant 0 : i32
    return %c0_i32, %c0_i32_0, %c0_i32_1 : i32, i32, i32
  }
  func.func @transform_10(%arg0: i32) -> (i32, i32, i32) {
    %c0_i32 = arith.constant 0 : i32
    %c0_i32_0 = arith.constant 0 : i32
    %c0_i32_1 = arith.constant 0 : i32
    %c0_i32_2 = arith.constant 0 : i32
    return %c0_i32, %c0_i32_0, %c0_i32_1 : i32, i32, i32
  }
  func.func @transform_11(%arg0: i32) -> (i32, i32, i32) {
    %c0_i32 = arith.constant 0 : i32
    %c0_i32_0 = arith.constant 0 : i32
    %c0_i32_1 = arith.constant 0 : i32
    %c0_i32_2 = arith.constant 0 : i32
    return %c0_i32, %c0_i32_0, %c0_i32_1 : i32, i32, i32
  }
  func.func @transform_12(%arg0: i32) -> (i32, i32) {
    %c0_i32 = arith.constant 0 : i32
    %c0_i32_0 = arith.constant 0 : i32
    %c0_i32_1 = arith.constant 0 : i32
    return %c0_i32, %c0_i32_0 : i32, i32
  }
  func.func @transform_13(%arg0: i32) -> (i32, i32) {
    %c0_i32 = arith.constant 0 : i32
    %c0_i32_0 = arith.constant 0 : i32
    %c0_i32_1 = arith.constant 0 : i32
    return %c0_i32, %c0_i32_0 : i32, i32
  }
  func.func @transform_14(%arg0: i32) -> (i32, i32, i32) {
    %c0_i32 = arith.constant 0 : i32
    %c0_i32_0 = arith.constant 0 : i32
    %c0_i32_1 = arith.constant 0 : i32
    return %arg0, %c0_i32, %c0_i32_0 : i32, i32, i32
  }
  func.func @transform_15(%arg0: i32) -> (i32, i32, i32) {
    %c0_i32 = arith.constant 0 : i32
    %c0_i32_0 = arith.constant 0 : i32
    %c0_i32_1 = arith.constant 0 : i32
    return %arg0, %c0_i32, %c0_i32_0 : i32, i32, i32
  }
  func.func @transform_16(%arg0: i32) -> (i32, i32, i32) {
    %c0_i32 = arith.constant 0 : i32
    %c0_i32_0 = arith.constant 0 : i32
    %c0_i32_1 = arith.constant 0 : i32
    return %arg0, %c0_i32, %c0_i32_0 : i32, i32, i32
  }
}

</mosaic_0001>

<bundles_post_ra>
// kernel: forward.1
= control target key start
LH: loop header
LB: loop body
LE: loop exit
PB: predicated region body
PF: predicated region fallthrough
CT: control target
= control target key end

     0   :  { %s5112_s0 = inlined_call_operand.vmem [shape: f32[2,8,64], index: 0, kind: input, shape index: {}]   ;;  %s5113_s1 = inlined_call_operand.vmem [shape: f32[2,1,8], index: 1, kind: input, shape index: {}]   ;;  %s5114_s2 = inlined_call_operand.vmem [shape: s32[2,8,1], index: 2, kind: input, shape index: {}]   ;;  %s5115_s3 = inlined_call_operand.vmem [shape: f32[8,16], index: 3, kind: input, shape index: {}]   ;;  %s5116_s4 = inlined_call_operand.vmem [shape: f32[8,16], index: 4, kind: input, shape index: {}]   ;;  %s5117_s5 = inlined_call_operand.vmem [shape: f32[2,1,64], index: 5, kind: input, shape index: {}]   ;;  %s5118_s6 = inlined_call_operand.vmem [shape: f32[2,1,64], index: 6, kind: input, shape index: {}]   ;;  %s5119_s7 = inlined_call_operand.vmem [shape: f32[2,64,192], index: 7, kind: input, shape index: {}]   ;;  %s5120_s8 = inlined_call_operand.vmem [shape: f32[2,1,192], index: 8, kind: input, shape index: {}]   ;;  %s5121_s9 = inlined_call_operand.vmem [shape: f32[2,64,64], index: 9, kind: input, shape index: {}]   ;;  %s5122_s10 = inlined_call_operand.vmem [shape: f32[2,64,256], index: 10, kind: input, shape index: {}]   ;;  %s5123_s11 = inlined_call_operand.vmem [shape: f32[2,128,64], index: 11, kind: input, shape index: {}]   ;;  %s5124_s12 = inlined_call_operand.vmem [shape: f32[1,64], index: 12, kind: input, shape index: {}]   ;;  %s5125_s13 = inlined_call_operand.vmem [shape: f32[64,256], index: 13, kind: input, shape index: {}]   ;;  %s5126_s14 = inlined_call_operand.hbm [shape: f32[2,8,256], index: 14, kind: output, shape index: {0}]   ;;  %s5127_s15 = inlined_call_operand.vmem [shape: f32[2,1,1], index: 15, kind: output, shape index: {1}]   ;;  %s5128_s16 = inlined_call_operand.vmem [shape: f32[2,1,1], index: 16, kind: output, shape index: {2}]  }
   0x1   :  { %5164 = sst [smem:[#allocation11_spill]] %s5112_s0 }
   0x2   :  { %5165 = sst [smem:[#allocation12_spill]] %s5113_s1 }
   0x3   :  { %5166 = sst [smem:[#allocation13_spill]] %s5114_s2 }
   0x4   :  { %22 = vsyncpa [#allocation3], 0 }
   0x5   :  { %24 = vsyncpa [#allocation3 + $0x1], 0  ;;  %s4146_s21 = smov 0   ;;  %s4148_s22 = smov 0  }
   0x6   :  { %s4150_s23 = smov 0   ;;  %s4152_s24 = smov 0  }
   0x7 LB: > { %5167 = sst [smem:[#allocation5_spill]] %s4026_s21  ;;  %s4167_s25 = sadd.s32 4294967295, %s4038_s24   ;;  %s4038_s24 = sphi %s4152_s24, %s5196_s24   ;;  %s4034_s23 = sphi %s4150_s23, %s5198_s23   ;;  %s4030_s22 = sphi %s4148_s22, %s5200_s22   ;;  %s4026_s21 = sphi %s4146_s21, %s5199_s21  }
   0x8   : > { %5168 = sst [smem:[#allocation6_spill]] %s4034_s23  ;;  %s3323_s26 = sadd.s32 4294967294, %s4038_s24  }
   0x9   : > { %5169 = sst [smem:[#allocation7_spill]] %s4038_s24  ;;  %s4171_s27 = sadd.s32 1, %s4038_s24  }
   0xa   : > { %5170 = sst [smem:[#allocation8_spill]] %s4171_s27  ;;  %s346_s28 = sadd.s32 1, %s4034_s23 }
   0xb   : > { %s343_s29 = ssub.s32 %s4038_s24, %s4171_s27  ;;  %p356_p0 = scmp.ne.s32.totalorder %s4034_s23, %s4030_s22 }
   0xc   : > { %p344_p1 = scmp.eq.s32.totalorder %s343_s29, 0  ;;  %p357_p2 = scmp.eq.s32.totalorder %s4167_s25, 1 }
   0xd   : > { %p362_p3 = scmp.ne.s32.totalorder %s4030_s22, %s4026_s21  ;;  %p363_p4 = scmp.eq.s32.totalorder %s3323_s26, 1 }
   0xe   : > { %s4182_s30 = scalar_select %p344_p1, %s4034_s23, %s346_s28  }
   0xf   : > { %p4184_p5 = por %p357_p2, %p356_p0  ;;  %p4188_p6 = por %p363_p4, %p362_p3 }
  0x10   : > { %5171 = sst [smem:[#allocation9_spill]] %s4182_s30  ;;  %p3326_p7 = scmp.ge.s32.totalorder %s4038_s24, 1 }
  0x11   : > { %s5173_s17 = scalar_select %p4188_p6, 1, 0 }
  0x12   : > { %p486_p8 = scmp.lt.s32.totalorder %s4038_s24, 3 }
  0x13   : > { %5174 = sst [smem:[#allocation10_spill]] %s5173_s17 }
  0x14   : > { %p487_p9 = pnand %p3326_p7, %p486_p8 }
  0x15   : > { %p548_p10 = scmp.lt.s32.totalorder (!%p487_p9), %s4167_s25, 1  ;;  %s5175_s28 = sld [smem:[#allocation11_spill]] (!%p487_p9)  ;;  %vm585_vm0 = vcmask (!%p487_p9), 523264   ;;  %v602_v3 = vld [vmem:[%s5119_s7 + $0x8] sm:$0xff] (!%p487_p9)  ;;  %v604_v4 = vld [vmem:[%s5119_s7 + $0x18] sm:$0xff] (!%p487_p9)  ;;  %v601_v6 = vld [vmem:[%s5119_s7] sm:$0xff] (!%p487_p9)  ;;  %v568_v36 = vlaneseq (!%p487_p9) }
  0x16   : > { %490 = sbr.rel (%p487_p9) target bundleno = 7750 (0x1e46), region = 76  ;;  %v3708_v5 = vpack.c.bf16 (!%p487_p9), %v604_v4, %v602_v3  ;;  %v603_v7 = vld [vmem:[%s5119_s7 + $0x10] sm:$0xff] (!%p487_p9)  ;;  %v606_v9 = vld [vmem:[%s5119_s7 + $0x28] sm:$0xff] (!%p487_p9)  ;;  %v608_v10 = vld [vmem:[%s5119_s7 + $0x38] sm:$0xff] (!%p487_p9)  ;;  %v4040_v16 = vmov (!%p487_p9), 0.0   ;;  %v4041_v28 = vmov (!%p487_p9), 0  }
  0x17   : > { %v3710_v8 = vpack.c.bf16 (!%p487_p9), %v603_v7, %v601_v6  ;;  %v605_v11 = vld [vmem:[%s5119_s7 + $0x20] sm:$0xff] (!%p487_p9)  ;;  %v3712_v12 = vpack.c.bf16 (!%p487_p9), %v608_v10, %v606_v9  ;;  %v607_v13 = vld [vmem:[%s5119_s7 + $0x30] sm:$0xff] (!%p487_p9)  ;;  %v610_v14 = vld [vmem:[%s5119_s7 + $0x48] sm:$0xff] (!%p487_p9)  ;;  %696 = vmatprep.mubr.f32.mxu0 (!%p487_p9), %v4040_v16  ;;  %3520 = vmatprep.subr.mxu1 (!%p487_p9), %v4040_v16  ;;  %v4266_v37 = vshrl.u32 (!%p487_p9), %v568_v36, 7  ;;  %s4042_s20 = smov (!%p487_p9), 72   ;;  %s5162_s24 = smov (!%p487_p9), 56  }
  0x18   : > { %3709 = vmatprep.subr.bf16.mxu0 (!%p487_p9), %v3708_v5  ;;  %v612_v15 = vld [vmem:[%s5119_s7 + $0x58] sm:$0xff] (!%p487_p9)  ;;  %v3714_v17 = vpack.c.bf16 (!%p487_p9), %v607_v13, %v605_v11  ;;  %v609_v19 = vld [vmem:[%s5119_s7 + $0x40] sm:$0xff] (!%p487_p9)  ;;  %v611_v20 = vld [vmem:[%s5119_s7 + $0x50] sm:$0xff] (!%p487_p9)  ;;  %3919 = vset.pattern.permute.xlu0 (!%p487_p9), %v4041_v28  ;;  %s5136_s21 = smov (!%p487_p9), 120   ;;  %vm713_vm1 = vcmask (!%p487_p9), 64512   ;;  %s5158_s27 = smov (!%p487_p9), 8  }
  0x19   : > { %3711 = vmatpush1.bf16.msra.mxu0 (!%p487_p9), %v3710_v8  ;;  %v3716_v18 = vpack.c.bf16 (!%p487_p9), %v612_v15, %v610_v14  ;;  %v614_v21 = vld [vmem:[%s5119_s7 + $0x68] sm:$0xff] (!%p487_p9)  ;;  %v616_v22 = vld [vmem:[%s5119_s7 + $0x78] sm:$0xff] (!%p487_p9)  ;;  %v3718_v23 = vpack.c.bf16 (!%p487_p9), %v611_v20, %v609_v19  ;;  %v613_v25 = vld [vmem:[%s5119_s7 + $0x60] sm:$0xff] (!%p487_p9)  ;;  %v4269_v38 = vsub.s32 (!%p487_p9), 0, %v4266_v37  ;;  %vm4048_vm2 = vmmov (!%p487_p9), 0   ;;  %s5142_s17 = smov (!%p487_p9), 40  }
  0x1a   : > { %3713 = vmatprep.subr.bf16.mxu0 (!%p487_p9), %v3712_v12  ;;  %v3720_v24 = vpack.c.bf16 (!%p487_p9), %v616_v22, %v614_v21  ;;  %v615_v26 = vld [vmem:[%s5119_s7 + $0x70] sm:$0xff] (!%p487_p9)  ;;  %v3330_v33 = vld [vmem:[%s5117_s5] ss:$0 sm:$0xff] (!%p487_p9)  ;;  %3522 = vmatprep.mubr.msk.f32.mxu1 (!%p487_p9), %vm4048_vm2, %v4040_v16  ;;  %s5140_s26 = smov (!%p487_p9), 104   ;;  %v625_v57 = vsub.s32 (!%p487_p9), 1, %v4266_v37  ;;  %vm738_vm3 = vcmask (!%p487_p9), 130048  }
  0x1b   : > { %v3722_v27 = vpack.c.bf16 (!%p487_p9), %v615_v26, %v613_v25  ;;  %v617_v39 = vld [vmem:[%s5120_s8] sm:$0x3] (!%p487_p9)  ;;  %s5176_s1 = sld [smem:[#allocation12_spill]] (!%p487_p9)  ;;  %v4352_v12 = vand.u32 (!%p487_p9), 127, %v568_v36  ;;  %v4052_v14 = vmov (!%p487_p9), -1e+09  }
  0x1c   : > { %v622_v40 = vrot.slane (!%p487_p9), %v617_v39, %v4269_v38  ;;  %v4287_v45 = vld [vmem:[%s5115_s3] sm:$0xff] (!%p487_p9)  ;;  %v626_v60 = vrot.slane (!%p487_p9), %v617_v39, %v625_v57  ;;  %s5154_s23 = smov (!%p487_p9), 24   ;;  %s5152_s30 = smov (!%p487_p9), 88   ;;  %vm1523_vm8 = vcmask (!%p487_p9), 261120   ;;  %vm1525_vm9 = vcmask (!%p487_p9), 392192  }
  0x1d   : > { %s4196_s18 = scalar_select %p548_p10, %s4167_s25, 1  ;;  %3715 = vmatpush1.bf16.msra.mxu0 %v3714_v17  ;;  %v4300_v46 = vld [vmem:[%s5116_s4] sm:$0xff]  ;;  %vm574_vm5 = vcmp.le.s32.totalorder %v4352_v12, %v4266_v37  ;;  %vm3160_vm13 = vcmask 7168   ;;  %vm3168_vm14 = vcmask 0  }
  0x1e   : > { %3717 = vmatprep.subr.bf16.mxu0 %v3716_v18  ;;  %s5192_s2 = sld [smem:[#allocation13_spill]] }
  0x1f   : > { %s5133_s19 = sshll.u32 %s4196_s18, 3 }
  0x20   : > { %s551_s29 = scalar_lea.vmem %s5175_s28, %s5133_s19  ;;  %s5150_s19 = smov 80  }
  0x21   : > { %v4204_v0 = vld [vmem:[%s551_s29] sm:$0xff]  ;;  %3719 = vmatpush1.bf16.msra.mxu0 %v3718_v23  ;;  %s5138_s29 = smov 64   ;;  %s5156_s28 = smov 16  }
  0x22   : > { %v584_v1 = vmul.f32 %v4204_v0, %v4204_v0  ;;  %3721 = vmatprep.subr.bf16.mxu0 %v3720_v24 }
  0x24   : > { %v586_v2 = vsel %vm585_vm0, %v584_v1, 0.0 }
  0x25   : > { %587 = vadd.xlane.f32.xlu0 %v586_v2  ;;  %3723 = vmatpush1.bf16.msra.mxu0 %v3722_v27 }
  0xb2   : > { %v588_v29 = vpop.xlane.xlu0 %587 }
  0xb3   : > { %v590_v30 = vmul.f32 0.015625, %v588_v29 }
  0xb5   : > { %v591_v31 = vadd.f32 1e-06, %v590_v30 }
  0xb7   : > { %3920 = vrsqrt.f32 %v591_v31 }
  0xc1   : > { %v3921_v32 = vpop.eup %3920 }
  0xc2   : > { %v593_v34 = vmul.f32 %v3921_v32, %v4204_v0 }
  0xc4   : > { %v600_v35 = vmul.f32 %v3330_v33, %v593_v34 }
  0xc6   : > { %3331 = vmatmul.mubr.msk.f32.vlgmr.msra.gmra.mrb[0].mxu0 %vm585_vm0, %v600_v35 }
  0xc7   : > { %3576 = vmatprep.mubr.msk.f32.mxu0 %vm4048_vm2, %v4040_v16 }
 0x199   : > { %v698_v41 = vpop.f32.mrb[0].mxu0 }
 0x19a   : > { %v4275_v42 = vadd.f32 %v698_v41, %v622_v40  ;;  %v700_v43 = vpop.f32.mrb[1].mxu0 }
 0x19b   : > { %v4331_v1 = vadd.f32 %v700_v43, %v626_v60 }
 0x19c   : > { %725 = vrot.lane.b32.xlu1 %v4275_v42, %s4042_s20  ;;  %v4280_v44 = vsub.f32 0.0, %v4275_v42  ;;  %v703_v61 = vmul.f32 %v4275_v42, %v4287_v45 }
 0x19e   : > { %722 = vrot.lane.b32.xlu0 %v4280_v44, %s5162_s24 }
 0x1a0   : > { %718 = vrot.lane.b32.xlu1 %v4287_v45, %s5138_s29 }
 0x1a2   : > { %924 = vrot.lane.b32.xlu0 %v4275_v42, %s5162_s24  ;;  %s5183_s24 = smov 120  }
 0x1a6   : > { %907 = vrot.lane.b32.xlu0 %v4275_v42, %s5136_s21 }
 0x1aa   : > { %917 = vrot.lane.b32.xlu0 %v4287_v45, %s5150_s19 }
 0x20e   : > { %v726_v47 = vpop.permute.xlu1 %725 }
 0x210   : > { %v723_v48 = vpop.permute.xlu0 %722 }
 0x211   : > { %v728_v49 = vsel %vm713_vm1, %v723_v48, %v726_v47 }
 0x212   : > { %v729_v50 = vmul.f32 %v728_v49, %v4300_v46  ;;  %v4313_v51 = vpop.permute.xlu1 %718 }
 0x213   : > { %v721_v52 = vmul.f32 %v4313_v51, %v4275_v42 }
 0x214   : > { %731 = vrot.lane.b32.xlu1 %v729_v50, %s5138_s29  ;;  %v925_v2 = vpop.permute.xlu0 %924 }
 0x218   : > { %706 = vrot.lane.b32.xlu1 %v4280_v44, %s5136_s21  ;;  %v908_v7 = vpop.permute.xlu0 %907  ;;  %s554_s21 = scalar_lea.vmem %s5176_s1, %s4196_s18 }
 0x219   : > { %v572_v10 = vld [vmem:[%s554_s21] sm:$0x1]  ;;  %s5160_s21 = smov 48  }
 0x21a   : > { %vm573_vm4 = vcmp.gt.f32.partialorder %v572_v10, 0.0 }
 0x21b   : > { %v575_v11 = vsel %vm573_vm4, 1, %v4041_v28 }
 0x21c   : > { %710 = vrot.lane.b32.xlu1 %v4275_v42, %s5158_s27  ;;  %v579_v13 = vrot.slane %v575_v11, %v4269_v38  ;;  %v4361_v22 = vpop.permute.xlu0 %917 }
 0x21d   : > { %v920_v24 = vmul.f32 %v4361_v22, %v4275_v42 }
 0x21e   : > { %vm580_vm6 = vcmp.eq.s32.totalorder %v579_v13, 1 }
 0x21f   : > { %vm581_vm7 = vmand %vm574_vm5, %vm580_vm6 }
 0x220   : > { %v4357_v15 = vsel %vm581_vm7, 0.0, %v4052_v14 }
 0x286   : > { %v732_v53 = vpop.permute.xlu1 %731 }
 0x287   : > { %v734_v54 = vadd.f32 %v732_v53, %v721_v52 }
 0x289   : > { %736 = vrot.lane.b32.xlu1 %v734_v54, %s5138_s29  ;;  %s5146_s29 = smov 112  }
 0x28a   : > { %v707_v55 = vpop.permute.xlu1 %706 }
 0x28d   : > { %921 = vrot.lane.b32.xlu1 %v4280_v44, %s5142_s17 }
 0x28e   : > { %v711_v56 = vpop.permute.xlu1 %710 }
 0x28f   : > { %v714_v58 = vsel %vm713_vm1, %v707_v55, %v711_v56 }
 0x290   : > { %v715_v59 = vmul.f32 %v714_v58, %v4300_v46 }
 0x291   : > { %904 = vrot.lane.b32.xlu1 %v4280_v44, %s5140_s26 }
 0x292   : > { %v716_v63 = vadd.f32 %v715_v59, %v703_v61 }
 0x2fb   : > { %v737_v62 = vpop.permute.xlu1 %736 }
 0x2fc   : > { %3521 = vmatpush3.xpose.msk.msra.mxu1 %vm738_vm3, %v737_v62 }
 0x2fd   : > { %3525 = vmatprep.subr.mxu1 %v4040_v16 }
 0x2ff   : > { %v922_v3 = vpop.permute.xlu1 %921  ;;  %3523 = vmatmul.mubr.msk.f32.vlgmr.msra.gmra.mrb[0].mxu1 %vm738_vm3, %v716_v63 }
 0x300   : > { %v927_v4 = vsel %vm713_vm1, %v922_v3, %v925_v2  ;;  %3526 = vmatpush3.msra.mxu1 %v4331_v1  ;;  %3527 = vmatprep.mubr.msk.f32.mxu1 %vm4048_vm2, %v4040_v16 }
 0x301   : > { %v928_v5 = vmul.f32 %v927_v4, %v4300_v46  ;;  %3530 = vmatprep.subr.mxu1 %v4040_v16 }
 0x303   : > { %v905_v6 = vpop.permute.xlu1 %904  ;;  %930 = vrot.lane.b32.xlu0 %v928_v5, %s5150_s19 }
 0x304   : > { %v910_v8 = vsel %vm713_vm1, %v905_v6, %v908_v7 }
 0x305   : > { %v911_v9 = vmul.f32 %v910_v8, %v4300_v46 }
 0x307   : > { %900 = vrot.lane.b32.xlu0 %v4287_v45, %s5156_s28 }
 0x30b   : > { %913 = vrot.lane.b32.xlu0 %v911_v9, %s5156_s28 }
 0x375   : > { %v931_v23 = vpop.permute.xlu0 %930 }
 0x376   : > { %v933_v25 = vadd.f32 %v931_v23, %v920_v24 }
 0x379   : > { %v4375_v32 = vpop.permute.xlu0 %900 }
 0x37a   : > { %v903_v35 = vmul.f32 %v4375_v32, %v4275_v42 }
 0x37d   : > { %v914_v34 = vpop.permute.xlu0 %913 }
 0x37e   : > { %v916_v39 = vadd.f32 %v914_v34, %v903_v35 }
 0x3d2   : > { %v810_v17 = vpop.f32.mrb[0].mxu1 }
 0x3d3   : > { %v814_v18 = vmul.f32 0.25, %v810_v17  ;;  %v3524_v19 = vpop.f32.mrb[1].mxu1 }
 0x3d5   : > { %v815_v20 = vadd.f32 %v814_v18, %v4357_v15 }
 0x3d7   : > { %v816_v21 = vsel %vm713_vm1, %v815_v20, -inf }
 0x3d8   : > { %817 = vmax.xlane.f32.xlu1 %v816_v21 }
 0x3e9   : > { %938 = vrot.lane.b32.xlu1 %v933_v25, %s5160_s21 }
 0x3ed   : > { %1125 = vrot.lane.b32.xlu1 %v4280_v44, %s5154_s23 }
 0x3f1   : > { %1128 = vrot.lane.b32.xlu1 %v4275_v42, %s5142_s17  ;;  %s5144_s17 = smov 32  }
 0x3f5   : > { %1108 = vrot.lane.b32.xlu1 %v4280_v44, %s5152_s30 }
 0x3f9   : > { %1111 = vrot.lane.b32.xlu1 %v4275_v42, %s5140_s26  ;;  %s5148_s26 = smov 96  }
 0x465   : > { %v818_v26 = vpop.xlane.xlu1 %817 }
 0x466   : > { %v819_v27 = vsub.f32 %v815_v20, %v818_v26 }
 0x468   : > { %v820_v28 = vmul.f32 1.442695, %v819_v27 }
 0x469   : > { %v939_v31 = vpop.permute.xlu1 %938 }
 0x46a   : > { %3922 = vpow2.f32 %v820_v28 }
 0x46d   : > { %v1126_v33 = vpop.permute.xlu1 %1125 }
 0x471   : > { %v1129_v36 = vpop.permute.xlu1 %1128 }
 0x472   : > { %v1131_v41 = vsel %vm713_vm1, %v1126_v33, %v1129_v36 }
 0x473   : > { %v1132_v43 = vmul.f32 %v1131_v41, %v4300_v46 }
 0x474   : > { %v3923_v29 = vpop.eup %3922 }
 0x475   : > { %v822_v30 = vsel %vm713_vm1, %v3923_v29, 0.0  ;;  %v1109_v40 = vpop.permute.xlu1 %1108 }
 0x476   : > { %823 = vadd.xlane.f32.xlu0 %v822_v30 }
 0x479   : > { %v1112_v47 = vpop.permute.xlu1 %1111 }
 0x47a   : > { %v1114_v48 = vsel %vm713_vm1, %v1109_v40, %v1112_v47 }
 0x47b   : > { %v1115_v49 = vmul.f32 %v1114_v48, %v4300_v46 }
 0x48c   : > { %935 = vrot.lane.b32.xlu0 %v916_v39, %s5146_s29 }
 0x490   : > { %1121 = vrot.lane.b32.xlu0 %v4287_v45, %s5148_s26 }
 0x494   : > { %1134 = vrot.lane.b32.xlu0 %v1132_v43, %s5148_s26 }
 0x498   : > { %1104 = vrot.lane.b32.xlu0 %v4287_v45, %s5144_s17 }
 0x49c   : > { %1117 = vrot.lane.b32.xlu0 %v1115_v49, %s5144_s17 }
 0x503   : > { %v824_v50 = vpop.xlane.xlu0 %823 }
 0x504   : > { %3924 = vrcp.f32 %v824_v50 }
 0x507   : > { %v936_v54 = vpop.permute.xlu0 %935 }
 0x50b   : > { %v4401_v62 = vpop.permute.xlu0 %1121 }
 0x50c   : > { %v1124_v25 = vmul.f32 %v4401_v62, %v4275_v42 }
 0x50e   : > { %v3925_v52 = vpop.eup %3924 }
 0x50f   : > { %v826_v53 = vmul.f32 %v3925_v52, %v3923_v29  ;;  %v1135_v2 = vpop.permute.xlu0 %1134 }
 0x510   : > { %v1137_v26 = vadd.f32 %v1135_v2, %v1124_v25  ;;  %v1528_v25 = vld [vmem:[%s5121_s9 + $0x8] sm:$0xff] }
 0x511   : > { %3528 = vmatmul.mubr.msk.f32.vlgmr.msra.gmra.mrb[2].mxu1 %vm713_vm1, %v826_v53 }
 0x512   : > { %3531 = vmatpush3.xpose.msk.msra.mxu1 %vm738_vm3, %v939_v31  ;;  %3532 = vmatprep.mubr.msk.f32.mxu1 %vm4048_vm2, %v4040_v16 }
 0x513   : > { %3535 = vmatprep.subr.mxu1 %v4040_v16  ;;  %v4404_v3 = vpop.permute.xlu0 %1104 }
 0x514   : > { %v1107_v5 = vmul.f32 %v4404_v3, %v4275_v42 }
 0x515   : > { %3533 = vmatmul.mubr.msk.f32.vlgmr.msra.gmra.mrb[4].mxu1 %vm738_vm3, %v936_v54 }
 0x516   : > { %3537 = vmatprep.mubr.msk.f32.mxu1 %vm4048_vm2, %v4040_v16 }
 0x517   : > { %v1118_v4 = vpop.permute.xlu0 %1117 }
 0x518   : > { %v1120_v6 = vadd.f32 %v1118_v4, %v1107_v5 }
 0x5e4   : > { %v4398_v55 = vpop.f32.mrb[2].mxu1 }
 0x5e5   : > { %v3529_v56 = vpop.f32.mrb[3].mxu1 }
 0x5e8   : > { %v1010_v58 = vpop.f32.mrb[4].mxu1 }
 0x5e9   : > { %v1014_v59 = vmul.f32 0.25, %v1010_v58  ;;  %v3534_v60 = vpop.f32.mrb[5].mxu1 }
 0x5eb   : > { %v1015_v61 = vadd.f32 %v1014_v59, %v4357_v15 }
 0x5ed   : > { %v1016_v63 = vsel %vm713_vm1, %v1015_v61, -inf }
 0x5ee   : > { %1017 = vmax.xlane.f32.xlu1 %v1016_v63 }
 0x5ff   : > { %1028 = vrot.lane.b32.xlu1 %v4331_v1, %s5146_s29 }
 0x603   : > { %1139 = vrot.lane.b32.xlu1 %v1120_v6, %s5148_s26 }
 0x607   : > { %1328 = vrot.lane.b32.xlu1 %v4280_v44, %s5158_s27  ;;  %s5181_s27 = smov 24  }
 0x60b   : > { %1331 = vrot.lane.b32.xlu1 %v4275_v42, %s5154_s23  ;;  %s5179_s23 = smov 40  }
 0x60f   : > { %1311 = vrot.lane.b32.xlu1 %v4280_v44, %s4042_s20 }
 0x613   : > { %1314 = vrot.lane.b32.xlu1 %v4275_v42, %s5152_s30  ;;  %s5180_s30 = smov 104  }
 0x617   : > { %1324 = vrot.lane.b32.xlu1 %v4287_v45, %s5146_s29 }
 0x67b   : > { %v1018_v7 = vpop.xlane.xlu1 %1017 }
 0x67c   : > { %v1019_v8 = vsub.f32 %v1015_v61, %v1018_v7 }
 0x67e   : > { %v1020_v9 = vmul.f32 1.442695, %v1019_v8 }
 0x67f   : > { %v1029_v10 = vpop.permute.xlu1 %1028 }
 0x680   : > { %3926 = vpow2.f32 %v1020_v9  ;;  %3536 = vmatpush3.msra.mxu1 %v1029_v10 }
 0x681   : > { %3540 = vmatprep.subr.mxu1 %v4040_v16 }
 0x683   : > { %v1140_v11 = vpop.permute.xlu1 %1139 }
 0x687   : > { %v1329_v13 = vpop.permute.xlu1 %1328 }
 0x68a   : > { %v3927_v14 = vpop.eup %3926 }
 0x68b   : > { %v1332_v17 = vpop.permute.xlu1 %1331  ;;  %v1022_v44 = vsel %vm713_vm1, %v3927_v14, 0.0 }
 0x68c   : > { %v1334_v18 = vsel %vm713_vm1, %v1329_v13, %v1332_v17  ;;  %1023 = vadd.xlane.f32.xlu0 %v1022_v44 }
 0x68d   : > { %v1335_v19 = vmul.f32 %v1334_v18, %v4300_v46 }
 0x68f   : > { %1337 = vrot.lane.b32.xlu1 %v1335_v19, %s5146_s29  ;;  %v1312_v20 = vpop.permute.xlu1 %1311  ;;  %s5186_s29 = smov 16  }
 0x693   : > { %1307 = vrot.lane.b32.xlu1 %v4287_v45, %s5160_s21  ;;  %v1315_v21 = vpop.permute.xlu1 %1314 }
 0x694   : > { %v1317_v23 = vsel %vm713_vm1, %v1312_v20, %v1315_v21 }
 0x695   : > { %v1318_v24 = vmul.f32 %v1317_v23, %v4300_v46 }
 0x697   : > { %1320 = vrot.lane.b32.xlu1 %v1318_v24, %s5160_s21  ;;  %v4444_v41 = vpop.permute.xlu1 %1324 }
 0x698   : > { %v1327_v47 = vmul.f32 %v4444_v41, %v4275_v42 }
 0x6a2   : > { %1142 = vrot.lane.b32.xlu0 %v1137_v26, %s5144_s17  ;;  %v1529_v26 = vld [vmem:[%s5121_s9 + $0x10] sm:$0xff] }
 0x701   : > { %v1338_v43 = vpop.permute.xlu1 %1337 }
 0x702   : > { %v1340_v48 = vadd.f32 %v1338_v43, %v1327_v47 }
 0x705   : > { %v4453_v58 = vpop.permute.xlu1 %1307 }
 0x706   : > { %v1310_v60 = vmul.f32 %v4453_v58, %v4275_v42 }
 0x709   : > { %v1321_v59 = vpop.permute.xlu1 %1320 }
 0x70a   : > { %v1323_v61 = vadd.f32 %v1321_v59, %v1310_v60 }
 0x719   : > { %v1024_v27 = vpop.xlane.xlu0 %1023 }
 0x71a   : > { %3928 = vrcp.f32 %v1024_v27  ;;  %v4059_v27 = vmov 0.0|0.0  }
 0x71b   : > { %3724 = vmatprep.subr.bf16.mxu0 %v4059_v27 }
 0x71d   : > { %v1143_v30 = vpop.permute.xlu0 %1142 }
 0x724   : > { %v3929_v28 = vpop.eup %3928 }
 0x725   : > { %v1026_v29 = vmul.f32 %v3929_v28, %v3927_v14 }
 0x727   : > { %3538 = vmatmul.mubr.msk.f32.vlgmr.msra.gmra.mrb[6].mxu1 %vm713_vm1, %v1026_v29  ;;  %v1530_v29 = vld [vmem:[%s5121_s9 + $0x18] sm:$0xff] }
 0x728   : > { %3541 = vmatpush3.xpose.msk.msra.mxu1 %vm738_vm3, %v1143_v30  ;;  %3542 = vmatprep.mubr.msk.f32.mxu1 %vm4048_vm2, %v4040_v16  ;;  %v3728_v30 = vpack.c.bf16 %v1530_v29, %v1529_v26 }
 0x729   : > { %3545 = vmatprep.subr.mxu1 %v4040_v16 }
 0x72b   : > { %3543 = vmatmul.mubr.msk.f32.vlgmr.msra.gmra.mrb[8].mxu1 %vm738_vm3, %v1140_v11 }
 0x72c   : > { %3547 = vmatprep.mubr.msk.f32.mxu1 %vm4048_vm2, %v4040_v16 }
 0x7fa   : > { %v1100_v31 = vpop.f32.mrb[6].mxu1 }
 0x7fb   : > { %v3539_v33 = vpop.f32.mrb[7].mxu1 }
 0x7fc   : > { %v1532_v33 = vld [vmem:[%s5121_s9 + $0x28] sm:$0xff] }
 0x7fe   : > { %v1214_v34 = vpop.f32.mrb[8].mxu1 }
 0x7ff   : > { %v1218_v35 = vmul.f32 0.25, %v1214_v34  ;;  %v3544_v36 = vpop.f32.mrb[9].mxu1 }
 0x800   : > { %v1534_v36 = vld [vmem:[%s5121_s9 + $0x38] sm:$0xff] }
 0x801   : > { %v1219_v39 = vadd.f32 %v1218_v35, %v4357_v15  ;;  %v1533_v35 = vld [vmem:[%s5121_s9 + $0x30] sm:$0xff] }
 0x803   : > { %v1220_v40 = vsel %vm713_vm1, %v1219_v39, -inf }
 0x804   : > { %1221 = vmax.xlane.f32.xlu0 %v1220_v40 }
 0x81a   : > { %1231 = vrot.lane.b32.xlu0 %v4331_v1, %s5148_s26  ;;  %s5178_s26 = smov 8  }
 0x81e   : > { %1345 = vrot.lane.b32.xlu0 %v1340_v48, %s5156_s28 }
 0x891   : > { %v1222_v49 = vpop.xlane.xlu0 %1221 }
 0x892   : > { %v1223_v50 = vsub.f32 %v1219_v39, %v1222_v49  ;;  %v3734_v39 = vpack.c.bf16 %v1534_v36, %v1533_v35  ;;  %v1724_v35 = vld [vmem:[%s5123_s11 + $0x8] sm:$0xff] }
 0x894   : > { %v1224_v52 = vmul.f32 1.442695, %v1223_v50 }
 0x895   : > { %v1232_v53 = vpop.permute.xlu0 %1231 }
 0x896   : > { %3930 = vpow2.f32 %v1224_v52  ;;  %3546 = vmatpush3.msra.mxu1 %v1232_v53 }
 0x897   : > { %3550 = vmatprep.subr.mxu1 %v4040_v16 }
 0x899   : > { %v1346_v5 = vpop.permute.xlu0 %1345 }
 0x8a0   : > { %v3931_v54 = vpop.eup %3930 }
 0x8a1   : > { %v1226_v56 = vsel %vm713_vm1, %v3931_v54, 0.0 }
 0x8a2   : > { %1227 = vadd.xlane.f32.xlu1 %v1226_v56 }
 0x8b3   : > { %1342 = vrot.lane.b32.xlu1 %v1323_v61, %s5150_s19  ;;  %v1626_v61 = vld [vmem:[%s5122_s10 + $0x8] sm:$0xff] }
 0x92f   : > { %v1228_v63 = vpop.xlane.xlu1 %1227 }
 0x930   : > { %3932 = vrcp.f32 %v1228_v63  ;;  %v1628_v63 = vld [vmem:[%s5122_s10 + $0x18] sm:$0xff] }
 0x933   : > { %v1343_v6 = vpop.permute.xlu1 %1342 }
 0x93a   : > { %v3933_v2 = vpop.eup %3932 }
 0x93b   : > { %v1230_v4 = vmul.f32 %v3933_v2, %v3931_v54  ;;  %v3736_v2 = vpack.c.bf16 %v1628_v63, %v1626_v61  ;;  %v1734_v61 = vld [vmem:[%s5123_s11 + $0x58] sm:$0xff] }
 0x93d   : > { %3548 = vmatmul.mubr.msk.f32.vlgmr.msra.gmra.mrb[10].mxu1 %vm713_vm1, %v1230_v4  ;;  %v1627_v4 = vld [vmem:[%s5122_s10 + $0x10] sm:$0xff] }
 0x93e   : > { %3551 = vmatpush3.xpose.msk.msra.mxu1 %vm738_vm3, %v1346_v5  ;;  %3552 = vmatprep.mubr.msk.f32.mxu1 %vm4048_vm2, %v4040_v16 }
 0x93f   : > { %3555 = vmatprep.subr.mxu1 %v4040_v16 }
 0x941   : > { %3553 = vmatmul.mubr.msk.f32.vlgmr.msra.gmra.mrb[12].mxu1 %vm738_vm3, %v1343_v6  ;;  %v1630_v6 = vld [vmem:[%s5122_s10 + $0x28] sm:$0xff] }
 0x942   : > { %3557 = vmatprep.mubr.msk.f32.mxu1 %vm4048_vm2, %v4040_v16 }
 0xa10   : > { %v1303_v42 = vpop.f32.mrb[10].mxu1 }
 0xa11   : > { %v3549_v7 = vpop.f32.mrb[11].mxu1 }
 0xa14   : > { %v1417_v8 = vpop.f32.mrb[12].mxu1 }
 0xa15   : > { %v1421_v9 = vmul.f32 0.25, %v1417_v8  ;;  %v3554_v10 = vpop.f32.mrb[13].mxu1  ;;  %v1629_v8 = vld [vmem:[%s5122_s10 + $0x20] sm:$0xff] }
 0xa17   : > { %v1422_v11 = vadd.f32 %v1421_v9, %v4357_v15  ;;  %v1631_v9 = vld [vmem:[%s5122_s10 + $0x30] sm:$0xff] }
 0xa18   : > { %v3742_v10 = vpack.c.bf16 %v1631_v9, %v1629_v8 }
 0xa19   : > { %v1423_v13 = vsel %vm713_vm1, %v1422_v11, -inf }
 0xa1a   : > { %1424 = vmax.xlane.f32.xlu0 %v1423_v13  ;;  %v1636_v13 = vld [vmem:[%s5122_s10 + $0x58] sm:$0xff] }
 0xa30   : > { %1434 = vrot.lane.b32.xlu0 %v4331_v1, %s5150_s19  ;;  %v1527_v1 = vld [vmem:[%s5121_s9] sm:$0xff]  ;;  %s5177_s19 = smov 56  }
 0xa31   : > { %v3725_v28 = vpack.c.bf16 %v1528_v25, %v1527_v1 }
 0xa33   : > { %3726 = vmatpush3.bf16.msra.mxu0 %v3725_v28 }
 0xa34   : > { %1515 = vrot.lane.b32.xlu0 %v1303_v42, %s5144_s17  ;;  %3727 = vmatprep.subr.bf16.mxu0 %v4059_v27  ;;  %v1632_v42 = vld [vmem:[%s5122_s10 + $0x38] sm:$0xff]  ;;  %s5187_s17 = smov 96  }
 0xa35   : > { %v3740_v7 = vpack.c.bf16 %v1632_v42, %v1630_v6  ;;  %v1738_v6 = vld [vmem:[%s5123_s11 + $0x78] sm:$0xff] }
 0xa37   : > { %3729 = vmatpush3.bf16.msra.mxu0 %v3728_v30  ;;  %v3345_v30 = vld [vmem:[%s5118_s6] ss:$0 sm:$0xff] }
 0xa38   : > { %3730 = vmatprep.subr.bf16.mxu0 %v4059_v27 }
 0xaa7   : > { %v1425_v14 = vpop.xlane.xlu0 %1424 }
 0xaa8   : > { %v1426_v17 = vsub.f32 %v1422_v11, %v1425_v14  ;;  %v1634_v11 = vld [vmem:[%s5122_s10 + $0x48] sm:$0xff] }
 0xaa9   : > { %v3744_v14 = vpack.c.bf16 %v1636_v13, %v1634_v11 }
 0xaaa   : > { %v1427_v44 = vmul.f32 1.442695, %v1426_v17  ;;  %v1633_v17 = vld [vmem:[%s5122_s10 + $0x40] sm:$0xff] }
 0xaab   : > { %v1435_v18 = vpop.permute.xlu0 %1434 }
 0xaac   : > { %3934 = vpow2.f32 %v1427_v44  ;;  %3556 = vmatpush3.msra.mxu1 %v1435_v18  ;;  %v1635_v44 = vld [vmem:[%s5122_s10 + $0x50] sm:$0xff] }
 0xaad   : > { %3737 = vmatprep.subr.bf16.mxu1 %v3736_v2  ;;  %v3746_v18 = vpack.c.bf16 %v1635_v44, %v1633_v17  ;;  %v1735_v2 = vld [vmem:[%s5123_s11 + $0x60] sm:$0xff] }
 0xaaf   : > { %v1516_v48 = vpop.permute.xlu0 %1515 }
 0xab6   : > { %v3935_v19 = vpop.eup %3934 }
 0xab7   : > { %v1429_v20 = vsel %vm713_vm1, %v3935_v19, 0.0 }
 0xab8   : > { %1430 = vadd.xlane.f32.xlu1 %v1429_v20  ;;  %v1640_v20 = vld [vmem:[%s5122_s10 + $0x78] sm:$0xff] }
 0xac9   : > { %1511 = vrot.lane.b32.xlu1 %v1100_v31, %s5156_s28  ;;  %v1531_v31 = vld [vmem:[%s5121_s9 + $0x20] sm:$0xff]  ;;  %s5182_s28 = smov 64  }
 0xaca   : > { %v3731_v34 = vpack.c.bf16 %v1532_v33, %v1531_v31 }
 0xacc   : > { %3732 = vmatpush3.bf16.msra.mxu0 %v3731_v34  ;;  %v1723_v34 = vld [vmem:[%s5123_s11] sm:$0xff] }
 0xacd   : > { %3733 = vmatprep.subr.bf16.mxu0 %v4059_v27  ;;  %v3753_v36 = vpack.c.bf16 %v1724_v35, %v1723_v34  ;;  %v3359_v35 = vld [vmem:[%s5119_s7 + $0xc8] sm:$0xff] }
 0xad0   : > { %3735 = vmatpush3.bf16.msra.mxu0 %v3734_v39  ;;  %v1725_v39 = vld [vmem:[%s5123_s11 + $0x10] sm:$0xff] }
 0xad1   : > { %3752 = vmatprep.subr.bf16.mxu0 %v4059_v27 }
 0xb45   : > { %v1431_v21 = vpop.xlane.xlu1 %1430 }
 0xb46   : > { %3936 = vrcp.f32 %v1431_v21 }
 0xb49   : > { %v1512_v47 = vpop.permute.xlu1 %1511 }
 0xb4a   : > { %v1522_v49 = vsel %vm738_vm3, %v4398_v55, %v1512_v47  ;;  %v1727_v47 = vld [vmem:[%s5123_s11 + $0x20] sm:$0xff] }
 0xb4b   : > { %v1524_v50 = vsel %vm1523_vm8, %v1522_v49, %v1516_v48  ;;  %v1728_v48 = vld [vmem:[%s5123_s11 + $0x28] sm:$0xff] }
 0xb4c   : > { %v3759_v49 = vpack.c.bf16 %v1728_v48, %v1727_v47  ;;  %v3363_v48 = vld [vmem:[%s5119_s7 + $0xe8] sm:$0xff] }
 0xb50   : > { %v3937_v23 = vpop.eup %3936 }
 0xb51   : > { %v1433_v24 = vmul.f32 %v3937_v23, %v3935_v19  ;;  %v1638_v19 = vld [vmem:[%s5122_s10 + $0x68] sm:$0xff]  ;;  %v1637_v23 = vld [vmem:[%s5122_s10 + $0x60] sm:$0xff] }
 0xb52   : > { %v3748_v21 = vpack.c.bf16 %v1640_v20, %v1638_v19 }
 0xb53   : > { %3558 = vmatmul.mubr.msk.f32.vlgmr.msra.gmra.mrb[14].mxu1 %vm713_vm1, %v1433_v24  ;;  %v1639_v24 = vld [vmem:[%s5122_s10 + $0x70] sm:$0xff] }
 0xb54   : > { %1708 = vmatprep.mubr.f32.mxu1 %v4040_v16  ;;  %v3750_v1 = vpack.c.bf16 %v1639_v24, %v1637_v23  ;;  %v3351_v23 = vld [vmem:[%s5119_s7 + $0x88] sm:$0xff]  ;;  %v3353_v24 = vld [vmem:[%s5119_s7 + $0x98] sm:$0xff] }
 0xc26   : > { %v1506_v40 = vpop.f32.mrb[14].mxu1 }
 0xc27   : > { %1519 = vrot.lane.b32.xlu0 %v1506_v40, %s5160_s21  ;;  %v3559_v43 = vpop.f32.mrb[15].mxu1  ;;  %v1726_v40 = vld [vmem:[%s5123_s11 + $0x18] sm:$0xff]  ;;  %s5184_s21 = smov 88  }
 0xc28   : > { %v3756_v43 = vpack.c.bf16 %v1726_v40, %v1725_v39  ;;  %v3358_v40 = vld [vmem:[%s5119_s7 + $0xc0] sm:$0xff] }
 0xc99   : > { %v1520_v52 = vpop.permute.xlu0 %1519 }
 0xc9a   : > { %v1526_v53 = vsel %vm1525_vm9, %v1524_v50, %v1520_v52  ;;  %v1729_v50 = vld [vmem:[%s5123_s11 + $0x30] sm:$0xff]  ;;  %v1730_v52 = vld [vmem:[%s5123_s11 + $0x38] sm:$0xff] }
 0xc9b   : > { %3577 = vmatmul.mubr.msk.f32.vlgmr.msra.gmra.mrb[2].mxu0 %vm585_vm0, %v1526_v53  ;;  %v3762_v53 = vpack.c.bf16 %v1730_v52, %v1729_v50  ;;  %v3362_v52 = vld [vmem:[%s5119_s7 + $0xe0] sm:$0xff] }
 0xc9c   : > { %3611 = vmatprep.mubr.msk.f32.mxu0 %vm4048_vm2, %v4040_v16  ;;  %3754 = vmatpush3.bf16.msra.mxu0 %v3753_v36  ;;  %v3361_v36 = vld [vmem:[%s5119_s7 + $0xd8] sm:$0xff] }
 0xc9d   : > { %3755 = vmatprep.subr.bf16.mxu0 %v4059_v27  ;;  %v3784_v39 = vpack.c.bf16 %v3361_v36, %v3359_v35 }
 0xca0   : > { %3757 = vmatpush3.bf16.msra.mxu0 %v3756_v43  ;;  %v3360_v43 = vld [vmem:[%s5119_s7 + $0xd0] sm:$0xff] }
 0xca1   : > { %3758 = vmatprep.subr.bf16.mxu0 %v4059_v27  ;;  %v3786_v47 = vpack.c.bf16 %v3360_v43, %v3358_v40 }
 0xca4   : > { %3760 = vmatpush3.bf16.msra.mxu0 %v3759_v49  ;;  %v3365_v49 = vld [vmem:[%s5119_s7 + $0xf8] sm:$0xff] }
 0xca5   : > { %3761 = vmatprep.subr.bf16.mxu0 %v4059_v27  ;;  %v3788_v50 = vpack.c.bf16 %v3365_v49, %v3363_v48 }
 0xca8   : > { %3763 = vmatpush3.bf16.msra.mxu0 %v3762_v53  ;;  %v3364_v53 = vld [vmem:[%s5119_s7 + $0xf0] sm:$0xff] }
 0xca9   : > { %3764 = vmatprep.subr.bf16.mxu0 %v4059_v27 }
 0xd6e   : > { %v1604_v54 = vpop.f32.mrb[2].mxu0 }
 0xd6f   : > { %v4513_v56 = vadd.f32 %v1604_v54, %v4204_v0  ;;  %v3578_v59 = vpop.f32.mrb[3].mxu0  ;;  %v1625_v0 = vld [vmem:[%s5122_s10] sm:$0xff] }
 0xd70   : > { %v3738_v5 = vpack.c.bf16 %v1627_v4, %v1625_v0  ;;  %v1731_v54 = vld [vmem:[%s5123_s11 + $0x40] sm:$0xff]  ;;  %v1732_v59 = vld [vmem:[%s5123_s11 + $0x48] sm:$0xff] }
 0xd71   : > { %v1610_v55 = vmul.f32 %v4513_v56, %v4513_v56  ;;  %v1736_v0 = vld [vmem:[%s5123_s11 + $0x68] sm:$0xff] }
 0xd72   : > { %3739 = vmatpush1.bf16.msra.mxu1 %v3738_v5  ;;  %v3771_v4 = vpack.c.bf16 %v1736_v0, %v1735_v2  ;;  %v1737_v5 = vld [vmem:[%s5123_s11 + $0x70] sm:$0xff] }
 0xd73   : > { %v1611_v60 = vsel %vm585_vm0, %v1610_v55, 0.0  ;;  %3741 = vmatprep.subr.bf16.mxu1 %v3740_v7  ;;  %v3765_v55 = vpack.c.bf16 %v1732_v59, %v1731_v54  ;;  %v3774_v42 = vpack.c.bf16 %v1738_v6, %v1737_v5  ;;  %v3790_v54 = vpack.c.bf16 %v3364_v53, %v3362_v52 }
 0xd74   : > { %1612 = vadd.xlane.f32.xlu0 %v1611_v60  ;;  %v1733_v60 = vld [vmem:[%s5123_s11 + $0x50] sm:$0xff] }
 0xd75   : > { %3766 = vmatpush3.bf16.msra.mxu0 %v3765_v55  ;;  %v3768_v63 = vpack.c.bf16 %v1734_v61, %v1733_v60 }
 0xd76   : > { %3743 = vmatpush1.bf16.msra.mxu1 %v3742_v10  ;;  %3767 = vmatprep.subr.bf16.mxu0 %v4059_v27 }
 0xd77   : > { %3745 = vmatprep.subr.bf16.mxu1 %v3744_v14 }
 0xd79   : > { %3769 = vmatpush3.bf16.msra.mxu0 %v3768_v63  ;;  %v3349_v63 = vld [vmem:[%s5117_s5 + $0x1] ss:$0 sm:$0xff] }
 0xd7a   : > { %3747 = vmatpush1.bf16.msra.mxu1 %v3746_v18  ;;  %3770 = vmatprep.subr.bf16.mxu0 %v4059_v27 }
 0xd7b   : > { %3749 = vmatprep.subr.bf16.mxu1 %v3748_v21 }
 0xd7d   : > { %3772 = vmatpush3.bf16.msra.mxu0 %v3771_v4  ;;  %v3366_v4 = vld [vmem:[%s5120_s8 + $0x2] sm:$0x3] }
 0xd7e   : > { %3751 = vmatpush1.bf16.msra.mxu1 %v3750_v1  ;;  %3773 = vmatprep.subr.bf16.mxu0 %v4059_v27  ;;  %v3776_v1 = vpack.c.bf16 %v3353_v24, %v3351_v23  ;;  %v1850_v5 = vrot.slane %v3366_v4, %v4269_v38 }
 0xd80   : > { %3777 = vmatprep.subr.bf16.mxu1 %v3776_v1 }
 0xd81   : > { %3775 = vmatpush3.bf16.msra.mxu0 %v3774_v42 }
 0xd82   : > { %3634 = vmatprep.subr.mxu0 %v4040_v16 }
 0xe01   : > { %v1613_v25 = vpop.xlane.xlu0 %1612 }
 0xe02   : > { %v1614_v26 = vmul.f32 0.015625, %v1613_v25  ;;  %v3352_v25 = vld [vmem:[%s5119_s7 + $0x90] sm:$0xff] }
 0xe04   : > { %v1615_v28 = vadd.f32 1e-06, %v1614_v26 }
 0xe06   : > { %3938 = vrsqrt.f32 %v1615_v28  ;;  %v3355_v28 = vld [vmem:[%s5119_s7 + $0xa8] sm:$0xff] }
 0xe10   : > { %v3939_v29 = vpop.eup %3938 }
 0xe11   : > { %v1617_v31 = vmul.f32 %v3939_v29, %v4513_v56  ;;  %v3357_v29 = vld [vmem:[%s5119_s7 + $0xb8] sm:$0xff] }
 0xe13   : > { %v1624_v33 = vmul.f32 %v3345_v30, %v1617_v31  ;;  %v3780_v30 = vpack.c.bf16 %v3357_v29, %v3355_v28  ;;  %v3354_v31 = vld [vmem:[%s5119_s7 + $0xa0] sm:$0xff] }
 0xe15   : > { %3346 = vmatmul.mubr.msk.f32.vlgmr.msra.gmra.mrb[16].mxu1 %vm585_vm0, %v1624_v33  ;;  %v3356_v33 = vld [vmem:[%s5119_s7 + $0xb0] sm:$0xff] }
 0xe16   : > { %1924 = vmatprep.mubr.f32.mxu1 %v4040_v16  ;;  %v3782_v34 = vpack.c.bf16 %v3356_v33, %v3354_v31 }
 0xee8   : > { %v1710_v7 = vpop.f32.mrb[16].mxu1 }
 0xee9   : > { %v3347_v8 = vmul.f32 -1.442695, %v1710_v7  ;;  %v1712_v9 = vpop.f32.mrb[17].mxu1 }
 0xeeb   : > { %3940 = vpow2.f32 %v3347_v8 }
 0xef5   : > { %v3941_v10 = vpop.eup %3940 }
 0xef6   : > { %v1718_v11 = vadd.f32 1.0, %v3941_v10 }
 0xef8   : > { %3942 = vrcp.f32 %v1718_v11 }
 0xf02   : > { %v3943_v13 = vpop.eup %3942 }
 0xf03   : > { %v1721_v14 = vmul.f32 %v3943_v13, %v1710_v7 }
 0xf05   : > { %v1722_v17 = vmul.f32 %v1721_v14, %v1712_v9 }
 0xf07   : > { %3612 = vmatmul.mubr.f32.vlgmr.msra.gmra.mrb[4].mxu0 %v1722_v17 }
 0xf08   : > { %3636 = vmatprep.mubr.msk.f32.mxu0 %vm4048_vm2, %v4040_v16 }
 0xfda   : > { %v1805_v44 = vpop.f32.mrb[4].mxu0 }
 0xfdb   : > { %v4631_v18 = vadd.f32 %v1805_v44, %v4513_v56  ;;  %v3613_v19 = vpop.f32.mrb[5].mxu0  ;;  %v3350_v56 = vld [vmem:[%s5119_s7 + $0x80] sm:$0xff] }
 0xfdc   : > { %v3778_v26 = vpack.c.bf16 %v3352_v25, %v3350_v56 }
 0xfdd   : > { %v1812_v20 = vmul.f32 %v4631_v18, %v4631_v18 }
 0xfde   : > { %3779 = vmatpush1.bf16.msra.mxu1 %v3778_v26 }
 0xfdf   : > { %v1813_v21 = vsel %vm585_vm0, %v1812_v20, 0.0  ;;  %3781 = vmatprep.subr.bf16.mxu1 %v3780_v30 }
 0xfe0   : > { %1814 = vadd.xlane.f32.xlu1 %v1813_v21  ;;  %v1854_v21 = vrot.slane %v3366_v4, %v625_v57 }
 0xfe2   : > { %3783 = vmatpush1.bf16.msra.mxu1 %v3782_v34 }
 0xfe3   : > { %3785 = vmatprep.subr.bf16.mxu1 %v3784_v39 }
 0xfe6   : > { %3787 = vmatpush1.bf16.msra.mxu1 %v3786_v47 }
 0xfe7   : > { %3789 = vmatprep.subr.bf16.mxu1 %v3788_v50 }
 0xfea   : > { %3791 = vmatpush1.bf16.msra.mxu1 %v3790_v54 }
 0xfeb   : > { %3614 = vmatprep.subr.mxu1 %v4040_v16 }
0x106d   : > { %v1815_v59 = vpop.xlane.xlu1 %1814 }
0x106e   : > { %v1816_v55 = vmul.f32 0.015625, %v1815_v59 }
0x1070   : > { %v1817_v60 = vadd.f32 1e-06, %v1816_v55 }
0x1072   : > { %3944 = vrsqrt.f32 %v1817_v60 }
0x107c   : > { %v3945_v61 = vpop.eup %3944 }
0x107d   : > { %v1819_v2 = vmul.f32 %v3945_v61, %v4631_v18 }
0x107f   : > { %v1826_v0 = vmul.f32 %v3349_v63, %v1819_v2 }
0x1081   : > { %3367 = vmatmul.mubr.msk.f32.vlgmr.msra.gmra.mrb[18].mxu1 %vm585_vm0, %v1826_v0 }
0x1082   : > { %3616 = vmatprep.mubr.msk.f32.mxu1 %vm4048_vm2, %v4040_v16 }
0x1154   : > { %v1926_v6 = vpop.f32.mrb[18].mxu1 }
0x1155   : > { %v4696_v42 = vadd.f32 %v1926_v6, %v1850_v5  ;;  %v1928_v7 = vpop.f32.mrb[19].mxu1 }
0x1156   : > { %v4737_v25 = vadd.f32 %v1928_v7, %v1854_v21 }
0x1157   : > { %1948 = vrot.lane.b32.xlu1 %v4696_v42, %s4042_s20  ;;  %v1932_v8 = vsub.f32 0.0, %v4696_v42  ;;  %v1944_v13 = vmul.f32 %v4696_v42, %v4313_v51  ;;  %v1931_v24 = vmul.f32 %v4696_v42, %v4287_v45  ;;  %v2136_v4 = vmul.f32 %v4696_v42, %v4361_v22 }
0x1158   : > { %v2122_v7 = vmul.f32 %v4696_v42, %v4375_v32 }
0x1159   : > { %1945 = vrot.lane.b32.xlu0 %v1932_v8, %s5177_s19 }
0x115b   : > { %1938 = vrot.lane.b32.xlu1 %v4696_v42, %s5178_s26 }
0x115f   : > { %2137 = vrot.lane.b32.xlu1 %v1932_v8, %s5179_s23 }
0x1163   : > { %2123 = vrot.lane.b32.xlu1 %v1932_v8, %s5180_s30 }
0x1167   : > { %2335 = vrot.lane.b32.xlu1 %v1932_v8, %s5181_s27 }
0x11c9   : > { %v1949_v38 = vpop.permute.xlu1 %1948 }
0x11cb   : > { %v1946_v9 = vpop.permute.xlu0 %1945 }
0x11cc   : > { %v1951_v10 = vsel %vm713_vm1, %v1946_v9, %v1949_v38  ;;  %v2334_v9 = vmul.f32 %v4696_v42, %v4401_v62 }
0x11cd   : > { %v1952_v11 = vmul.f32 %v1951_v10, %v4300_v46  ;;  %v1939_v44 = vpop.permute.xlu1 %1938 }
0x11cf   : > { %1954 = vrot.lane.b32.xlu0 %v1952_v11, %s5182_s28 }
0x11d1   : > { %v2138_v23 = vpop.permute.xlu1 %2137 }
0x11d3   : > { %1934 = vrot.lane.b32.xlu0 %v1932_v8, %s5183_s24 }
0x11d5   : > { %v2124_v37 = vpop.permute.xlu1 %2123 }
0x11d9   : > { %v2336_v31 = vpop.permute.xlu1 %2335 }
0x1241   : > { %v1955_v14 = vpop.permute.xlu0 %1954 }
0x1242   : > { %v1957_v17 = vadd.f32 %v1955_v14, %v1944_v13  ;;  %v2320_v13 = vmul.f32 %v4696_v42, %v4404_v3 }
0x1244   : > { %1959 = vrot.lane.b32.xlu0 %v1957_v17, %s5182_s28 }
0x1245   : > { %v1935_v51 = vpop.permute.xlu0 %1934 }
0x1246   : > { %v1941_v19 = vsel %vm713_vm1, %v1935_v51, %v1939_v44  ;;  %v2531_v51 = vmul.f32 %v4696_v42, %v4444_v41 }
0x1247   : > { %v1942_v20 = vmul.f32 %v1941_v19, %v4300_v46 }
0x1248   : > { %2140 = vrot.lane.b32.xlu0 %v4696_v42, %s5177_s19  ;;  %s5188_s19 = smov 112  }
0x1249   : > { %v1943_v56 = vadd.f32 %v1942_v20, %v1931_v24  ;;  %v2517_v20 = vmul.f32 %v4696_v42, %v4453_v58 }
0x124c   : > { %2126 = vrot.lane.b32.xlu0 %v4696_v42, %s5183_s24 }
0x1250   : > { %2338 = vrot.lane.b32.xlu0 %v4696_v42, %s5179_s23  ;;  %s5190_s23 = smov 32  }
0x1254   : > { %2321 = vrot.lane.b32.xlu0 %v1932_v8, %s5184_s21 }
0x1258   : > { %2324 = vrot.lane.b32.xlu0 %v4696_v42, %s5180_s30 }
0x125c   : > { %2532 = vrot.lane.b32.xlu0 %v1932_v8, %s5178_s26  ;;  %s5189_s26 = smov 48  }
0x1260   : > { %2535 = vrot.lane.b32.xlu0 %v4696_v42, %s5181_s27  ;;  %s5191_s27 = sshll.u32 %s4196_s18, 3 }
0x1264   : > { %2518 = vrot.lane.b32.xlu0 %v1932_v8, %s4042_s20  ;;  %s5185_s20 = smov 80  }
0x1268   : > { %2521 = vrot.lane.b32.xlu0 %v4696_v42, %s5184_s21  ;;  %s558_s21 = scalar_lea.vmem %s5192_s2, %s5191_s27 }
0x12b6   : > { %v1960_v1 = vpop.permute.xlu0 %1959 }
0x12b7   : > { %3615 = vmatpush3.xpose.msk.msra.mxu1 %vm738_vm3, %v1960_v1 }
0x12b8   : > { %3619 = vmatprep.subr.mxu1 %v4040_v16 }
0x12ba   : > { %v2141_v26 = vpop.permute.xlu0 %2140  ;;  %3617 = vmatmul.mubr.msk.f32.vlgmr.msra.gmra.mrb[20].mxu1 %vm738_vm3, %v1943_v56 }
0x12bb   : > { %v2143_v28 = vsel %vm713_vm1, %v2138_v23, %v2141_v26  ;;  %3620 = vmatpush3.msra.mxu1 %v4737_v25  ;;  %3621 = vmatprep.mubr.msk.f32.mxu1 %vm4048_vm2, %v4040_v16 }
0x12bc   : > { %v2144_v45 = vmul.f32 %v2143_v28, %v4300_v46  ;;  %3624 = vmatprep.subr.mxu1 %v4040_v16 }
0x12be   : > { %2146 = vrot.lane.b32.xlu0 %v2144_v45, %s5185_s20  ;;  %v2127_v57 = vpop.permute.xlu0 %2126 }
0x12bf   : > { %v2129_v29 = vsel %vm713_vm1, %v2124_v37, %v2127_v57 }
0x12c0   : > { %v2130_v30 = vmul.f32 %v2129_v29, %v4300_v46 }
0x12c2   : > { %2132 = vrot.lane.b32.xlu0 %v2130_v30, %s5186_s29  ;;  %v2339_v33 = vpop.permute.xlu0 %2338 }
0x12c3   : > { %v2341_v34 = vsel %vm713_vm1, %v2336_v31, %v2339_v33 }
0x12c4   : > { %v2342_v35 = vmul.f32 %v2341_v34, %v4300_v46 }
0x12c6   : > { %2344 = vrot.lane.b32.xlu0 %v2342_v35, %s5187_s17  ;;  %v2322_v36 = vpop.permute.xlu0 %2321 }
0x12ca   : > { %v2325_v39 = vpop.permute.xlu0 %2324 }
0x12cb   : > { %v2327_v40 = vsel %vm713_vm1, %v2322_v36, %v2325_v39 }
0x12cc   : > { %v2328_v0 = vmul.f32 %v2327_v40, %v4300_v46 }
0x12ce   : > { %v2533_v43 = vpop.permute.xlu0 %2532 }
0x12d2   : > { %v2536_v47 = vpop.permute.xlu0 %2535 }
0x12d3   : > { %v2538_v48 = vsel %vm713_vm1, %v2533_v43, %v2536_v47 }
0x12d4   : > { %v2539_v49 = vmul.f32 %v2538_v48, %v4300_v46 }
0x12d6   : > { %2541 = vrot.lane.b32.xlu0 %v2539_v49, %s5188_s19  ;;  %v2519_v50 = vpop.permute.xlu0 %2518 }
0x12da   : > { %v2522_v52 = vpop.permute.xlu0 %2521 }
0x12db   : > { %v2524_v53 = vsel %vm713_vm1, %v2519_v50, %v2522_v52 }
0x12dc   : > { %v2525_v54 = vmul.f32 %v2524_v53, %v4300_v46 }
0x12de   : > { %2527 = vrot.lane.b32.xlu0 %v2525_v54, %s5189_s26 }
0x1330   : > { %v2147_v2 = vpop.permute.xlu0 %2146 }
0x1331   : > { %v2149_v6 = vadd.f32 %v2147_v2, %v2136_v4 }
0x1334   : > { %v2133_v5 = vpop.permute.xlu0 %2132 }
0x1335   : > { %v2135_v8 = vadd.f32 %v2133_v5, %v2122_v7 }
0x1338   : > { %v2345_v38 = vpop.permute.xlu0 %2344 }
0x1339   : > { %v2347_v46 = vadd.f32 %v2345_v38, %v2334_v9 }
0x1348   : > { %v2542_v17 = vpop.permute.xlu0 %2541 }
0x1349   : > { %v2544_v44 = vadd.f32 %v2542_v17, %v2531_v51  ;;  %v3380_v51 = vld [vmem:[%s5121_s9 + $0x40] sm:$0xff] }
0x1350   : > { %v2528_v19 = vpop.permute.xlu0 %2527 }
0x1351   : > { %v2530_v23 = vadd.f32 %v2528_v19, %v2517_v20  ;;  %v3383_v20 = vld [vmem:[%s5121_s9 + $0x58] sm:$0xff] }
0x138d   : > { %v2032_v59 = vpop.f32.mrb[20].mxu1 }
0x138e   : > { %v2036_v55 = vmul.f32 0.25, %v2032_v59  ;;  %v3618_v60 = vpop.f32.mrb[21].mxu1 }
0x1390   : > { %v2037_v61 = vadd.f32 %v2036_v55, %v4357_v15 }
0x1392   : > { %v2038_v63 = vsel %vm713_vm1, %v2037_v61, -inf }
0x1393   : > { %2039 = vmax.xlane.f32.xlu1 %v2038_v63 }
0x13a4   : > { %2330 = vrot.lane.b32.xlu1 %v2328_v0, %s5190_s23 }
0x13a8   : > { %2154 = vrot.lane.b32.xlu1 %v2149_v6, %s5189_s26 }
0x13ac   : > { %2151 = vrot.lane.b32.xlu1 %v2135_v8, %s5188_s19 }
0x13b0   : > { %2352 = vrot.lane.b32.xlu1 %v2347_v46, %s5190_s23 }
0x1420   : > { %v2040_v22 = vpop.xlane.xlu1 %2039 }
0x1421   : > { %v2041_v10 = vsub.f32 %v2037_v61, %v2040_v22 }
0x1423   : > { %v2042_v11 = vmul.f32 1.442695, %v2041_v10 }
0x1424   : > { %v2331_v14 = vpop.permute.xlu1 %2330 }
0x1425   : > { %3946 = vpow2.f32 %v2042_v11  ;;  %v2333_v32 = vadd.f32 %v2331_v14, %v2320_v13 }
0x1427   : > { %2349 = vrot.lane.b32.xlu1 %v2333_v32, %s5187_s17 }
0x1428   : > { %v2155_v62 = vpop.permute.xlu1 %2154 }
0x142b   : > { %2549 = vrot.lane.b32.xlu1 %v2544_v44, %s5186_s29  ;;  %v3382_v44 = vld [vmem:[%s5121_s9 + $0x50] sm:$0xff] }
0x142c   : > { %v2152_v21 = vpop.permute.xlu1 %2151 }
0x142f   : > { %v3947_v3 = vpop.eup %3946  ;;  %2546 = vrot.lane.b32.xlu1 %v2530_v23, %s5185_s20  ;;  %v3384_v23 = vld [vmem:[%s5121_s9 + $0x60] sm:$0xff] }
0x1430   : > { %v2353_v24 = vpop.permute.xlu1 %2352  ;;  %v2044_v1 = vsel %vm713_vm1, %v3947_v3, 0.0 }
0x1431   : > { %2045 = vadd.xlane.f32.xlu0 %v2044_v1  ;;  %3635 = vmatpush3.xpose.msk.msra.mxu0 %vm738_vm3, %v2353_v24  ;;  %v3386_v1 = vld [vmem:[%s5121_s9 + $0x70] sm:$0xff] }
0x1432   : > { %3644 = vmatprep.subr.mxu0 %v4040_v16 }
0x1499   : > { %v2350_v41 = vpop.permute.xlu1 %2349 }
0x149a   : > { %3637 = vmatmul.mubr.msk.f32.vlgmr.msra.gmra.mrb[6].mxu0 %vm738_vm3, %v2350_v41  ;;  %v3387_v41 = vld [vmem:[%s5121_s9 + $0x78] sm:$0xff] }
0x149b   : > { %3646 = vmatprep.mubr.msk.f32.mxu0 %vm4048_vm2, %v4040_v16 }
0x149d   : > { %v2550_v58 = vpop.permute.xlu1 %2549 }
0x149e   : > { %3645 = vmatpush3.xpose.msk.msra.mxu0 %vm738_vm3, %v2550_v58  ;;  %v3802_v58 = vpack.c.bf16 %v3387_v41, %v3386_v1  ;;  %v3416_v1 = vld [vmem:[%s5123_s11 + $0xb8] sm:$0xff] }
0x149f   : > { %3792 = vmatprep.subr.bf16.mxu0 %v4059_v27 }
0x14a1   : > { %v2547_v42 = vpop.permute.xlu1 %2546 }
0x14a2   : > { %3647 = vmatmul.mubr.msk.f32.vlgmr.msra.gmra.mrb[8].mxu0 %vm738_vm3, %v2547_v42 }
0x14a3   : > { %3670 = vmatprep.mubr.msk.f32.mxu0 %vm4048_vm2, %v4040_v16 }
0x14be   : > { %v2046_v56 = vpop.xlane.xlu0 %2045 }
0x14bf   : > { %3948 = vrcp.f32 %v2046_v56 }
0x14c9   : > { %v3949_v26 = vpop.eup %3948 }
0x14ca   : > { %v2048_v28 = vmul.f32 %v3949_v26, %v3947_v3  ;;  %v3385_v3 = vld [vmem:[%s5121_s9 + $0x68] sm:$0xff] }
0x14cb   : > { %v3799_v24 = vpack.c.bf16 %v3385_v3, %v3384_v23  ;;  %v3414_v23 = vld [vmem:[%s5123_s11 + $0xa8] sm:$0xff] }
0x14cc   : > { %3622 = vmatmul.mubr.msk.f32.vlgmr.msra.gmra.mrb[22].mxu1 %vm713_vm1, %v2048_v28 }
0x14cd   : > { %3625 = vmatpush3.xpose.msk.msra.mxu1 %vm738_vm3, %v2155_v62  ;;  %3626 = vmatprep.mubr.msk.f32.mxu1 %vm4048_vm2, %v4040_v16  ;;  %v3381_v62 = vld [vmem:[%s5121_s9 + $0x48] sm:$0xff] }
0x14ce   : > { %3629 = vmatprep.subr.mxu1 %v4040_v16  ;;  %v3793_v19 = vpack.c.bf16 %v3381_v62, %v3380_v51  ;;  %v3410_v51 = vld [vmem:[%s5123_s11 + $0x88] sm:$0xff] }
0x14d0   : > { %3627 = vmatmul.mubr.msk.f32.vlgmr.msra.gmra.mrb[24].mxu1 %vm738_vm3, %v2152_v21  ;;  %3794 = vmatpush3.bf16.msra.mxu0 %v3793_v19  ;;  %v3796_v21 = vpack.c.bf16 %v3383_v20, %v3382_v44  ;;  %v3411_v44 = vld [vmem:[%s5123_s11 + $0x90] sm:$0xff]  ;;  %v3412_v19 = vld [vmem:[%s5123_s11 + $0x98] sm:$0xff] }
0x14d1   : > { %3631 = vmatprep.mubr.msk.f32.mxu1 %vm4048_vm2, %v4040_v16  ;;  %3795 = vmatprep.subr.bf16.mxu0 %v4059_v27  ;;  %v3824_v20 = vpack.c.bf16 %v3412_v19, %v3411_v44  ;;  %v3425_v44 = vld [vmem:[%s5124_s12] ss:$0 sm:$0xff] }
0x14d4   : > { %3797 = vmatpush3.bf16.msra.mxu0 %v3796_v21  ;;  %v3413_v21 = vld [vmem:[%s5123_s11 + $0xa0] sm:$0xff] }
0x14d5   : > { %3798 = vmatprep.subr.bf16.mxu0 %v4059_v27  ;;  %v3827_v3 = vpack.c.bf16 %v3414_v23, %v3413_v21 }
0x14d8   : > { %3800 = vmatpush3.bf16.msra.mxu0 %v3799_v24  ;;  %v3415_v24 = vld [vmem:[%s5123_s11 + $0xb0] sm:$0xff] }
0x14d9   : > { %3801 = vmatprep.subr.bf16.mxu0 %v4059_v27  ;;  %v3830_v41 = vpack.c.bf16 %v3416_v1, %v3415_v24  ;;  %v3124_v24 = vld [vmem:[%s558_s21] sm:$0xff] }
0x14da   : > { %vm3155_vm12 = vcmp.ne.s32.totalorder %v3124_v24, 4294967196 }
0x14dc   : > { %3803 = vmatpush3.bf16.msra.mxu0 %v3802_v58  ;;  %v3417_v58 = vld [vmem:[%s5123_s11 + $0xc0] sm:$0xff] }
0x14dd   : > { %3820 = vmatprep.subr.bf16.mxu0 %v4059_v27 }
0x156d   : > { %v2424_v37 = vpop.f32.mrb[6].mxu0 }
0x156e   : > { %v2428_v45 = vmul.f32 0.25, %v2424_v37  ;;  %v3638_v57 = vpop.f32.mrb[7].mxu0 }
0x1570   : > { %v2429_v29 = vadd.f32 %v2428_v45, %v4357_v15 }
0x1572   : > { %v2430_v30 = vsel %vm713_vm1, %v2429_v29, -inf }
0x1573   : > { %2431 = vmax.xlane.f32.xlu1 %v2430_v30 }
0x1575   : > { %v2621_v31 = vpop.f32.mrb[8].mxu0 }
0x1576   : > { %v3648_v33 = vpop.f32.mrb[9].mxu0  ;;  %v2625_v39 = vmul.f32 0.25, %v2621_v31 }
0x1578   : > { %v2626_v49 = vadd.f32 %v2625_v39, %v4357_v15 }
0x157a   : > { %v2627_v50 = vsel %vm713_vm1, %v2626_v49, -inf }
0x1584   : > { %2441 = vrot.lane.b32.xlu1 %v4737_v25, %s5187_s17 }
0x159f   : > { %v4805_v34 = vpop.f32.mrb[22].mxu1 }
0x15a0   : > { %v3623_v35 = vpop.f32.mrb[23].mxu1 }
0x15a3   : > { %v2226_v36 = vpop.f32.mrb[24].mxu1 }
0x15a4   : > { %v2230_v40 = vmul.f32 0.25, %v2226_v36  ;;  %v3628_v43 = vpop.f32.mrb[25].mxu1 }
0x15a6   : > { %v2231_v47 = vadd.f32 %v2230_v40, %v4357_v15 }
0x15a8   : > { %v2232_v48 = vsel %vm713_vm1, %v2231_v47, -inf }
0x15a9   : > { %2233 = vmax.xlane.f32.xlu0 %v2232_v48  ;;  %v3394_v48 = vld [vmem:[%s5122_s10 + $0x98] sm:$0xff] }
0x15ad   : > { %2628 = vmax.xlane.f32.xlu0 %v2627_v50  ;;  %v3393_v50 = vld [vmem:[%s5122_s10 + $0x90] sm:$0xff] }
0x1600   : > { %v2432_v52 = vpop.xlane.xlu1 %2431 }
0x1601   : > { %v2433_v53 = vsub.f32 %v2429_v29, %v2432_v52 }
0x1603   : > { %v2434_v54 = vmul.f32 1.442695, %v2433_v53  ;;  %v3396_v53 = vld [vmem:[%s5122_s10 + $0xa8] sm:$0xff] }
0x1604   : > { %v2442_v13 = vpop.permute.xlu1 %2441 }
0x1605   : > { %3950 = vpow2.f32 %v2434_v54  ;;  %v3398_v54 = vld [vmem:[%s5122_s10 + $0xb8] sm:$0xff] }
0x160f   : > { %v3951_v59 = vpop.eup %3950 }
0x1610   : > { %v2436_v55 = vsel %vm713_vm1, %v3951_v59, 0.0 }
0x1611   : > { %2437 = vadd.xlane.f32.xlu0 %v2436_v55  ;;  %v3395_v55 = vld [vmem:[%s5122_s10 + $0xa0] sm:$0xff] }
0x1636   : > { %v2234_v60 = vpop.xlane.xlu0 %2233 }
0x1637   : > { %v2235_v61 = vsub.f32 %v2231_v47, %v2234_v60  ;;  %v3392_v47 = vld [vmem:[%s5122_s10 + $0x88] sm:$0xff]  ;;  %v3397_v60 = vld [vmem:[%s5122_s10 + $0xb0] sm:$0xff] }
0x1639   : > { %v2236_v0 = vmul.f32 1.442695, %v2235_v61  ;;  %v3810_v61 = vpack.c.bf16 %v3397_v60, %v3395_v55  ;;  %v3032_v60 = vld [vmem:[%s5125_s13] sm:$0xff] }
0x163a   : > { %v2629_v63 = vpop.xlane.xlu0 %2628 }
0x163b   : > { %v2630_v2 = vsub.f32 %v2626_v49, %v2629_v63  ;;  %v3804_v49 = vpack.c.bf16 %v3394_v48, %v3392_v47  ;;  %v3400_v63 = vld [vmem:[%s5122_s10 + $0xc8] sm:$0xff] }
0x163d   : > { %v2631_v4 = vmul.f32 1.442695, %v2630_v2  ;;  %v3402_v2 = vld [vmem:[%s5122_s10 + $0xd8] sm:$0xff] }
0x163f   : > { %3952 = vpow2.f32 %v2631_v4  ;;  %v3399_v4 = vld [vmem:[%s5122_s10 + $0xc0] sm:$0xff] }
0x1640   : > { %3954 = vpow2.f32 %v2236_v0  ;;  %v3812_v0 = vpack.c.bf16 %v3402_v2, %v3400_v63  ;;  %v3037_v63 = vld [vmem:[%s5125_s13 + $0x28] sm:$0xff]  ;;  %v3039_v2 = vld [vmem:[%s5125_s13 + $0x38] sm:$0xff] }
0x1649   : > { %v3953_v15 = vpop.eup %3952 }
0x164a   : > { %v2633_v5 = vsel %vm713_vm1, %v3953_v15, 0.0  ;;  %v3955_v6 = vpop.eup %3954 }
0x164b   : > { %2634 = vadd.xlane.f32.xlu0 %v2633_v5  ;;  %v2238_v7 = vsel %vm713_vm1, %v3955_v6, 0.0 }
0x164f   : > { %2239 = vadd.xlane.f32.xlu0 %v2238_v7  ;;  %v3406_v7 = vld [vmem:[%s5122_s10 + $0xf8] sm:$0xff] }
0x1665   : > { %2244 = vrot.lane.b32.xlu0 %v4737_v25, %s5188_s19  ;;  %s564_s19 = scalar_lea.vmem %s5128_s16, %s4196_s18 }
0x1669   : > { %2638 = vrot.lane.b32.xlu0 %v4737_v25, %s5185_s20  ;;  %s4060_s20 = smov [#allocation2]  }
0x166a   : > { %s3980_s17 = sshll.u32 %s4060_s20, 4  ;;  %s3981_s17 = int_to_ptr.vmem [resolvable:$false] %s3980_s17 }
0x166b   : > { %s3982_s2 = scalar_lea.vmem %s3981_s17, 512 }
0x169e   : > { %v2438_v8 = vpop.xlane.xlu0 %2437 }
0x16d8   : > { %v2635_v38 = vpop.xlane.xlu0 %2634 }
0x16dc   : > { %v2240_v9 = vpop.xlane.xlu0 %2239 }
0x16dd   : > { %3956 = vrcp.f32 %v2240_v9  ;;  %v3405_v9 = vld [vmem:[%s5122_s10 + $0xf0] sm:$0xff] }
0x16de   : > { %3958 = vrcp.f32 %v2438_v8 }
0x16df   : > { %3960 = vrcp.f32 %v2635_v38  ;;  %v3403_v38 = vld [vmem:[%s5122_s10 + $0xe0] sm:$0xff] }
0x16e0   : > { %v2245_v46 = vpop.permute.xlu0 %2244 }
0x16e1   : > { %3630 = vmatpush3.msra.mxu1 %v2245_v46  ;;  %v3818_v46 = vpack.c.bf16 %v3405_v9, %v3403_v38  ;;  %v3040_v38 = vld [vmem:[%s5125_s13 + $0x40] sm:$0xff]  ;;  %v3042_v9 = vld [vmem:[%s5125_s13 + $0x50] sm:$0xff] }
0x16e2   : > { %3639 = vmatprep.subr.mxu1 %v4040_v16 }
0x16e4   : > { %v2639_v32 = vpop.permute.xlu0 %2638 }
0x16e7   : > { %v3957_v22 = vpop.eup %3956 }
0x16e8   : > { %v2242_v10 = vmul.f32 %v3957_v22, %v3955_v6  ;;  %v3959_v11 = vpop.eup %3958  ;;  %v3404_v6 = vld [vmem:[%s5122_s10 + $0xe8] sm:$0xff] }
0x16e9   : > { %v2440_v25 = vmul.f32 %v3959_v11, %v3951_v59  ;;  %v3961_v14 = vpop.eup %3960  ;;  %v3808_v59 = vpack.c.bf16 %v3398_v54, %v3396_v53  ;;  %v3816_v8 = vpack.c.bf16 %v3406_v7, %v3404_v6  ;;  %v3033_v54 = vld [vmem:[%s5125_s13 + $0x8] sm:$0xff]  ;;  %v3043_v7 = vld [vmem:[%s5125_s13 + $0x58] sm:$0xff] }
0x16ea   : > { %3632 = vmatmul.mubr.msk.f32.vlgmr.msra.gmra.mrb[26].mxu1 %vm713_vm1, %v2242_v10  ;;  %v2637_v17 = vmul.f32 %v3961_v14, %v3953_v15  ;;  %v3401_v15 = vld [vmem:[%s5122_s10 + $0xd0] sm:$0xff]  ;;  %v3041_v6 = vld [vmem:[%s5125_s13 + $0x48] sm:$0xff] }
0x16eb   : > { %3640 = vmatpush3.msra.mxu1 %v2442_v13  ;;  %3641 = vmatprep.mubr.msk.f32.mxu1 %vm4048_vm2, %v4040_v16  ;;  %v3814_v5 = vpack.c.bf16 %v3401_v15, %v3399_v4  ;;  %v3036_v4 = vld [vmem:[%s5125_s13 + $0x20] sm:$0xff]  ;;  %v3038_v15 = vld [vmem:[%s5125_s13 + $0x30] sm:$0xff] }
0x16ec   : > { %3649 = vmatprep.subr.mxu1 %v4040_v16 }
0x16ee   : > { %3642 = vmatmul.mubr.msk.f32.vlgmr.msra.gmra.mrb[28].mxu1 %vm713_vm1, %v2440_v25  ;;  %v3390_v25 = vld [vmem:[%s5118_s6 + $0x1] ss:$0 sm:$0xff] }
0x16ef   : > { %3650 = vmatpush3.msra.mxu1 %v2639_v32  ;;  %3651 = vmatprep.mubr.msk.f32.mxu1 %vm4048_vm2, %v4040_v16 }
0x16f0   : > { %3805 = vmatprep.subr.bf16.mxu1 %v3804_v49 }
0x16f2   : > { %3652 = vmatmul.mubr.msk.f32.vlgmr.msra.gmra.mrb[30].mxu1 %vm713_vm1, %v2637_v17  ;;  %v3409_v17 = vld [vmem:[%s5123_s11 + $0x80] sm:$0xff] }
0x16f3   : > { %2913 = vmatprep.mubr.f32.mxu1 %v4040_v16  ;;  %v3821_v62 = vpack.c.bf16 %v3410_v51, %v3409_v17 }
0x17bd   : > { %v2316_v42 = vpop.f32.mrb[26].mxu1 }
0x17be   : > { %2715 = vrot.lane.b32.xlu0 %v2316_v42, %s5186_s29  ;;  %v3633_v56 = vpop.f32.mrb[27].mxu1  ;;  %v3418_v42 = vld [vmem:[%s5123_s11 + $0xc8] sm:$0xff]  ;;  %s3435_s29 = sshll.u32 %s4167_s25, 8 }
0x17bf   : > { %v3833_v56 = vpack.c.bf16 %v3418_v42, %v3417_v58  ;;  %s5067_s24 = scalar_lea.hbm %s5126_s14, %s3435_s29 }
0x17c1   : > { %v2513_v26 = vpop.f32.mrb[28].mxu1 }
0x17c2   : > { %2719 = vrot.lane.b32.xlu0 %v2513_v26, %s5190_s23  ;;  %v3643_v28 = vpop.f32.mrb[29].mxu1  ;;  %v3419_v26 = vld [vmem:[%s5123_s11 + $0xd0] sm:$0xff] }
0x17c3   : > { %v3420_v28 = vld [vmem:[%s5123_s11 + $0xd8] sm:$0xff] }
0x17c5   : > { %v2710_v37 = vpop.f32.mrb[30].mxu1 }
0x17c6   : > { %2723 = vrot.lane.b32.xlu1 %v2710_v37, %s5189_s26  ;;  %v3653_v45 = vpop.f32.mrb[31].mxu1  ;;  %v3836_v37 = vpack.c.bf16 %v3420_v28, %v3419_v26  ;;  %s535_s26 = sand.u32 1, %s4030_s22   ;;  %v3140_v26 = vadd.s32 128, %v4352_v12 }
0x17c7   : > { %v3421_v45 = vld [vmem:[%s5123_s11 + $0xe0] sm:$0xff]  ;;  %s3327_s23 = sshll.u32 %s535_s26, 4  ;;  %s3179_s21 = scalar_lea.sflag [#allocation3], %s535_s26 }
0x17c8   : > { %s5038_s30 = scalar_lea.vmem [#allocation2], %s3327_s23 }
0x17c9   : > { %s3199_s23 = sshll.u32 %s5038_s30, 4  ;;  %s3200_s23 = int_to_ptr.vmem [resolvable:$true] %s3199_s23 }
0x17ca   : > { %s3976_s1 = scalar_lea.vmem %s3200_s23, 256  ;;  %p3983_p0 = scmp.lt.s32.totalorder %s3200_s23, %s3981_s17 }
0x17cb   : > { %p3977_p11 = scmp.ne.s32.totalorder %s3200_s23, %s3976_s1  ;;  %p3984_p1 = scmp.lt.s32.totalorder %s3982_s2, %s3976_s1 }
0x17cd   : > { %p3978_p12 = pnand %p3977_p11, %p4184_p5  ;;  %p3985_p2 = por %p3984_p1, %p3983_p0 }
0x17cf   : > { %p3979_p13 = pneg %p3978_p12 }
0x17d1   : > { %p3986_p3 = pnand %p3985_p2, %p3979_p13 }
0x1830   : > { %v2716_v57 = vpop.permute.xlu0 %2715 }
0x1831   : > { %v2726_v30 = vsel %vm738_vm3, %v4805_v34, %v2716_v57  ;;  %v3422_v57 = vld [vmem:[%s5123_s11 + $0xe8] sm:$0xff] }
0x1834   : > { %v2720_v29 = vpop.permute.xlu0 %2719 }
0x1835   : > { %v2727_v31 = vsel %vm1523_vm8, %v2726_v30, %v2720_v29  ;;  %v3839_v29 = vpack.c.bf16 %v3422_v57, %v3421_v45  ;;  %v3423_v30 = vld [vmem:[%s5123_s11 + $0xf0] sm:$0xff] }
0x1838   : > { %v2724_v33 = vpop.permute.xlu1 %2723 }
0x1839   : > { %v2728_v35 = vsel %vm1525_vm9, %v2727_v31, %v2724_v33  ;;  %v3424_v31 = vld [vmem:[%s5123_s11 + $0xf8] sm:$0xff] }
0x183a   : > { %3671 = vmatmul.mubr.msk.f32.vlgmr.msra.gmra.mrb[10].mxu0 %vm585_vm0, %v2728_v35  ;;  %v3842_v33 = vpack.c.bf16 %v3424_v31, %v3423_v30 }
0x183b   : > { %3705 = vmatprep.mubr.msk.f32.mxu0 %vm4048_vm2, %v4040_v16  ;;  %3822 = vmatpush3.bf16.msra.mxu0 %v3821_v62 }
0x183c   : > { %3823 = vmatprep.subr.bf16.mxu0 %v4059_v27 }
0x183f   : > { %3825 = vmatpush3.bf16.msra.mxu0 %v3824_v20 }
0x1840   : > { %3826 = vmatprep.subr.bf16.mxu0 %v4059_v27 }
0x1843   : > { %3828 = vmatpush3.bf16.msra.mxu0 %v3827_v3 }
0x1844   : > { %3829 = vmatprep.subr.bf16.mxu0 %v4059_v27 }
0x1847   : > { %3831 = vmatpush3.bf16.msra.mxu0 %v3830_v41 }
0x1848   : > { %3832 = vmatprep.subr.bf16.mxu0 %v4059_v27 }
0x184b   : > { %3834 = vmatpush3.bf16.msra.mxu0 %v3833_v56 }
0x184c   : > { %3835 = vmatprep.subr.bf16.mxu0 %v4059_v27 }
0x184f   : > { %3837 = vmatpush3.bf16.msra.mxu0 %v3836_v37 }
0x1850   : > { %3838 = vmatprep.subr.bf16.mxu0 %v4059_v27 }
0x1853   : > { %3840 = vmatpush3.bf16.msra.mxu0 %v3839_v29 }
0x1854   : > { %3841 = vmatprep.subr.bf16.mxu0 %v4059_v27 }
0x1857   : > { %3843 = vmatpush3.bf16.msra.mxu0 %v3842_v33 }
0x190d   : > { %v2807_v36 = vpop.f32.mrb[10].mxu0 }
0x190e   : > { %v4867_v39 = vadd.f32 %v2807_v36, %v4631_v18  ;;  %v3672_v40 = vpop.f32.mrb[11].mxu0  ;;  %v3391_v18 = vld [vmem:[%s5122_s10 + $0x80] sm:$0xff] }
0x190f   : > { %v3806_v52 = vpack.c.bf16 %v3393_v50, %v3391_v18 }
0x1910   : > { %v2814_v43 = vmul.f32 %v4867_v39, %v4867_v39 }
0x1911   : > { %3807 = vmatpush1.bf16.msra.mxu1 %v3806_v52 }
0x1912   : > { %v2815_v34 = vsel %vm585_vm0, %v2814_v43, 0.0  ;;  %3809 = vmatprep.subr.bf16.mxu1 %v3808_v59  ;;  %v3035_v59 = vld [vmem:[%s5125_s13 + $0x18] sm:$0xff] }
0x1913   : > { %2816 = vadd.xlane.f32.xlu0 %v2815_v34  ;;  %v3844_v55 = vpack.c.bf16 %v3035_v59, %v3033_v54 }
0x1915   : > { %3811 = vmatpush1.bf16.msra.mxu1 %v3810_v61 }
0x1916   : > { %3813 = vmatprep.subr.bf16.mxu1 %v3812_v0  ;;  %v3848_v0 = vpack.c.bf16 %v3039_v2, %v3037_v63 }
0x1919   : > { %3815 = vmatpush1.bf16.msra.mxu1 %v3814_v5  ;;  %v3850_v5 = vpack.c.bf16 %v3038_v15, %v3036_v4 }
0x191a   : > { %3817 = vmatprep.subr.bf16.mxu1 %v3816_v8  ;;  %v3852_v8 = vpack.c.bf16 %v3043_v7, %v3041_v6 }
0x191d   : > { %3819 = vmatpush1.bf16.msra.mxu1 %v3818_v46  ;;  %v3854_v46 = vpack.c.bf16 %v3042_v9, %v3040_v38 }
0x191e   : > { %3845 = vmatprep.subr.bf16.mxu1 %v3844_v55 }
0x19a0   : > { %v2817_v22 = vpop.xlane.xlu0 %2816 }
0x19a1   : > { %v2818_v10 = vmul.f32 0.015625, %v2817_v22  ;;  %v3045_v22 = vld [vmem:[%s5125_s13 + $0x68] sm:$0xff] }
0x19a3   : > { %v2819_v11 = vadd.f32 1e-06, %v2818_v10  ;;  %v3047_v10 = vld [vmem:[%s5125_s13 + $0x78] sm:$0xff] }
0x19a5   : > { %3962 = vrsqrt.f32 %v2819_v11  ;;  %v3856_v11 = vpack.c.bf16 %v3047_v10, %v3045_v22 }
0x19af   : > { %v3963_v13 = vpop.eup %3962 }
0x19b0   : > { %v2821_v14 = vmul.f32 %v3963_v13, %v4867_v39  ;;  %v3044_v13 = vld [vmem:[%s5125_s13 + $0x60] sm:$0xff] }
0x19b2   : > { %v2828_v32 = vmul.f32 %v3390_v25, %v2821_v14  ;;  %v3046_v25 = vld [vmem:[%s5125_s13 + $0x70] sm:$0xff] }
0x19b3   : > { %v3858_v14 = vpack.c.bf16 %v3046_v25, %v3044_v13 }
0x19b4   : > { %3407 = vmatmul.mubr.msk.f32.vlgmr.msra.gmra.mrb[32].mxu1 %vm585_vm0, %v2828_v32 }
0x19b5   : > { %3115 = vmatprep.mubr.f32.mxu1 %v4040_v16 }
0x1a87   : > { %v2915_v35 = vpop.f32.mrb[32].mxu1 }
0x1a88   : > { %v3408_v36 = vmul.f32 -1.442695, %v2915_v35  ;;  %v2917_v40 = vpop.f32.mrb[33].mxu1 }
0x1a8a   : > { %3964 = vpow2.f32 %v3408_v36 }
0x1a94   : > { %v3965_v43 = vpop.eup %3964 }
0x1a95   : > { %v2923_v34 = vadd.f32 1.0, %v3965_v43 }
0x1a97   : > { %3966 = vrcp.f32 %v2923_v34 }
0x1aa1   : > { %v3967_v47 = vpop.eup %3966 }
0x1aa2   : > { %v2926_v48 = vmul.f32 %v3967_v47, %v2915_v35 }
0x1aa4   : > { %v2927_v27 = vmul.f32 %v2926_v48, %v2917_v40 }
0x1aa6   : > { %3706 = vmatmul.mubr.f32.vlgmr.msra.gmra.mrb[12].mxu0 %v2927_v27 }
0x1b79   : > { %v3011_v49 = vpop.f32.mrb[12].mxu0 }
0x1b7a   : > { %v3015_v18 = vadd.f32 %v3011_v49, %v4867_v39  ;;  %v3707_v50 = vpop.f32.mrb[13].mxu0  ;;  %v3034_v39 = vld [vmem:[%s5125_s13 + $0x10] sm:$0xff] }
0x1b7b   : > { %v3846_v61 = vpack.c.bf16 %v3034_v39, %v3032_v60 }
0x1b7c   : > { %v3017_v52 = vmul.f32 %v3015_v18, %v3015_v18 }
0x1b7d   : > { %3847 = vmatpush1.bf16.msra.mxu1 %v3846_v61 }
0x1b7e   : > { %v3018_v53 = vsel %vm585_vm0, %v3017_v52, 0.0  ;;  %3849 = vmatprep.subr.bf16.mxu1 %v3848_v0 }
0x1b7f   : > { %3019 = vadd.xlane.f32.xlu1 %v3018_v53 }
0x1b81   : > { %3851 = vmatpush1.bf16.msra.mxu1 %v3850_v5 }
0x1b82   : > { %3853 = vmatprep.subr.bf16.mxu1 %v3852_v8 }
0x1b85   : > { %3855 = vmatpush1.bf16.msra.mxu1 %v3854_v46 }
0x1b86   : > { %3857 = vmatprep.subr.bf16.mxu1 %v3856_v11 }
0x1b89   : > { %3859 = vmatpush1.bf16.msra.mxu1 %v3858_v14 }
0x1c0c   : > { %v3020_v32 = vpop.xlane.xlu1 %3019 }
0x1c0d   : > { %v3021_v17 = vmul.f32 0.015625, %v3020_v32 }
0x1c0f   : > { %v3022_v51 = vadd.f32 1e-06, %v3021_v17 }
0x1c11   : > { %3968 = vrsqrt.f32 %v3022_v51 }
0x1c1b   : > { %v3969_v62 = vpop.eup %3968 }
0x1c1c   : > { %v3024_v19 = vmul.f32 %v3969_v62, %v3015_v18 }
0x1c1e   : > { %v3031_v20 = vmul.f32 %v3425_v44, %v3024_v19 }
0x1c20   : > { %3426 = vmatmul.mubr.msk.f32.vlgmr.msra.gmra.mrb[34].mxu1 %vm585_vm0, %v3031_v20 }
0x1cf3   : > { %v3117_v21 = vpop.f32.mrb[34].mxu1 }
0x1cf4   : > { %v3119_v23 = vpop.f32.mrb[35].mxu1  ;;  %3122 = vst [vmem:[%s5038_s30] sm:$0xff] %v3117_v21 }
0x1cf5   : > { %3123 = vst [vmem:[%s5038_s30 + $0x8] sm:$0xff] %v3119_v23  ;;  %v3125_v3 = vmax.f32 %v3117_v21, %v3119_v23 }
0x1cf7   : > { %3126 = vmax.xlane.f32.xlu0 %v3125_v3 }
0x1d0d   : > { %3142 = vperm.xlu0 %3919, %v3124_v24  }
0x1d84   : > { %v5047_v1 = vpop.xlane.xlu0 %3126 }
0x1d85   : > { %v3128_v41 = vsub.f32 %v3117_v21, %v5047_v1  ;;  %v3129_v58 = vsub.f32 %v3119_v23, %v5047_v1 }
0x1d87   : > { %v3130_v42 = vmul.f32 1.442695, %v3128_v41  ;;  %v3132_v56 = vmul.f32 1.442695, %v3129_v58 }
0x1d89   : > { %3970 = vpow2.f32 %v3130_v42 }
0x1d8a   : > { %3972 = vpow2.f32 %v3132_v56 }
0x1d8c   : > { %v3143_v28 = vpop.permute.xlu0 %3142 }
0x1d8d   : > { %vm3144_vm10 = vcmp.eq.s32.totalorder %v4352_v12, %v3143_v28  ;;  %vm3145_vm11 = vcmp.eq.s32.totalorder %v3140_v26, %v3143_v28  ;;  %v3429_v12 = vsel %vm3155_vm12, 1.0, %v4040_v16 }
0x1d8e   : > { %v3427_v37 = vsel %vm3144_vm10, 1.0, %v4040_v16  ;;  %v3428_v45 = vsel %vm3145_vm11, 1.0, %v4040_v16  ;;  %v3170_v36 = vsel %vm3160_vm13, %v3429_v12, 0.0 }
0x1d8f   : > { %v3150_v57 = vmul.f32 %v3427_v37, %v3117_v21  ;;  %v3151_v29 = vmul.f32 %v3428_v45, %v3119_v23  ;;  %v3171_v40 = vrot.slane %v3170_v36, 4 }
0x1d91   : > { %v3152_v30 = vadd.f32 %v3151_v29, %v3150_v57  ;;  %v3172_v43 = vadd.f32 %v3171_v40, %v3170_v36 }
0x1d93   : > { %v3971_v31 = vpop.eup %3970  ;;  %v3173_v34 = vrot.slane %v3172_v43, 2 }
0x1d94   : > { %v3973_v33 = vpop.eup %3972 }
0x1d95   : > { %v3134_v35 = vadd.f32 %v3973_v33, %v3971_v31  ;;  %v3174_v47 = vadd.f32 %v3173_v34, %v3172_v43 }
0x1d97   : > { %3135 = vadd.xlane.f32.xlu1 %v3134_v35  ;;  %v3175_v48 = vrot.slane %v3174_v47, 1 }
0x1d99   : > { %v3176_v27 = vadd.f32 %v3175_v48, %v3174_v47 }
0x1d9b   : > { %3153 = vadd.xlane.f32.xlu1 %v3152_v30  ;;  %3177 = vst.msk [vmem:[%s564_s19] sm:$0x1] %vm3168_vm14, %v3176_v27 }
0x1d9c   : > { %3989 = shalt.err (!%p3986_p3)
}
0x1d9d   : > { %s3990_s25 = scalar_lea.hbm %s5067_s24, 256  ;;  %s3994_s19 = scalar_lea.hbm %s5126_s14, 512 }
0x1d9e   : > { %p3991_p4 = scmp.ne.s32.totalorder %s5067_s24, %s3990_s25  ;;  %p3995_p9 = scmp.lt.u32.totalorder %s5067_s24, %s5126_s14 }
0x1d9f   : > { %p3996_p10 = scmp.lt.u32.totalorder %s3994_s19, %s3990_s25  ;;  %p3998_p12 = scmp.lt.u32.totalorder %s3990_s25, %s5067_s24 }
0x1da0   : > { %p3992_p7 = pnand %p3991_p4, %p4184_p5 }
0x1da1   : > { %p3997_p11 = por %p3996_p10, %p3995_p9 }
0x1da2   : > { %p3993_p8 = pneg %p3992_p7 }
0x1da3   : > { %p3999_p13 = por %p3998_p12, %p3997_p11 }
0x1da5   : > { %p4000_p0 = pnand %p3999_p13, %p3993_p8 }
0x1da7   : > { %4003 = shalt.err (!%p4000_p0)
}
0x1da8   : > { %3860 = dma.vmem_to_hbm [thread:$0]  (%p4184_p5), %s3200_s23, 256, %s5067_s24, %s3179_s21  }
0x1da9   : > { %s561_s0 = scalar_lea.vmem %s5127_s15, %s4196_s18 }
0x1e24   : > { %v3136_v16 = vpop.xlane.xlu1 %3135 }
0x1e25   : > { %3974 = vlog2.f32 %v3136_v16 }
0x1e28   : > { %v3154_v52 = vpop.xlane.xlu1 %3153 }
0x1e2f   : > { %v3975_v49 = vpop.eup %3974 }
0x1e30   : > { %v3138_v18 = vmul.f32 0.6931472, %v3975_v49 }
0x1e32   : > { %v3139_v50 = vadd.f32 %v3138_v18, %v5047_v1 }
0x1e34   : > { %v3158_v53 = vsub.f32 %v3139_v50, %v3154_v52 }
0x1e36   : > { %v3159_v54 = vmul.f32 %v3429_v12, %v3158_v53 }
0x1e38   : > { %v3161_v59 = vsel %vm3160_vm13, %v3159_v54, 0.0 }
0x1e39   : > { %v3162_v55 = vrot.slane %v3161_v59, 4 }
0x1e3b   : > { %v3163_v60 = vadd.f32 %v3162_v55, %v3161_v59 }
0x1e3d   : > { %v3164_v39 = vrot.slane %v3163_v60, 2 }
0x1e3f   : > { %v3165_v61 = vadd.f32 %v3164_v39, %v3163_v60 }
0x1e41   : > { %v3166_v63 = vrot.slane %v3165_v61, 1 }
0x1e43   : > { %v3167_v2 = vadd.f32 %v3166_v63, %v3165_v61 }
0x1e45   : > { %3169 = vst.msk [vmem:[%s561_s0] sm:$0x1] %vm3168_vm14, %v3167_v2 }
0x1e46 PF: > { %s5193_s23 = sld [smem:[#allocation7_spill]]  ;;  %s5194_s28 = sld [smem:[#allocation5_spill]] }
0x1e4c   : > { %p3866_p5 = scmp.ge.s32.totalorder %s5193_s23, 2  ;;  %s3217_s21 = sand.u32 1, %s5194_s28  }
0x1e4d   : > { %s3218_s20 = scalar_lea.sflag [#allocation3], %s3217_s21 }
0x1e4e   : > { %p3863_p1 = pnand %p3866_p5, %p4188_p6 }
0x1e50   : > { %4021 = dma.done.wait (!%p3863_p1), %s3218_s20, 256  }
0x1e51   : > { %4023 = vsyncadd (!%p3863_p1), %s3218_s20, 4294967040  ;;  %s5196_s24 = sld [smem:[#allocation8_spill]]  ;;  %s5197_s17 = sld [smem:[#allocation6_spill]] }
0x1e52   : > { %s5198_s23 = sld [smem:[#allocation9_spill]]  ;;  %s5199_s21 = smov %s4030_s22 }
0x1e57   : > { %p27_p2 = scmp.ge.s32.totalorder %s5196_s24, 4   ;;  %s5200_s22 = smov %s5197_s17 }
0x1e59   :  { %29 = sbr.rel (!%p27_p2) target bundleno = 7 (0x7), region = 148 }
0x1e60   :  { %3235 = vsyncpa [#allocation3], 1 }
0x1e61   :  { %3237 = vsyncpa [#allocation3 + $0x1], 1 }

</bundles_post_ra>
